<compile_context>
chip_gen: v7x
topology: tpu7x:2x2x1
jax: 0.10.0
libtpu: 0.0.40
codegen_flags: <defaults>
</compile_context>

<pallas_src>
import functools

import jax
import jax.numpy as jnp
from jax.experimental import pallas as pl
from jax.experimental.pallas import tpu as pltpu


def _round_up(x, m):
    return (x + m - 1) // m * m


def _fused_conv3x3_kernel(x_ref, w_ref, b_ref, out_ref, *, H, W):
    """Fused 3x3 / stride-1 / pad-1 conv producing both heads for one image.

    x_ref:   (1, H*W, Cin)        input image, spatial-major (flattened NHWC)
    w_ref:   (9, Cin, Cout_pad)   fused bf16 weights, tap index = kh*3 + kw
    b_ref:   (1, Cout_pad)        fused f32 bias (zero in the pad columns)
    out_ref: (1, H*W, Cout_pad)   fused lane-dense output: loc || conf || pad
    """
    HW = H * W
    cin = x_ref.shape[2]

    # bf16 image once; all 9 tap operands are shifted views of this value.
    xb = x_ref[0].astype(jnp.bfloat16)                        # (HW, Cin)

    # Column index of every flat spatial position (sublane axis); masks the
    # horizontal taps whose left/right neighbour would wrap to the next row.
    col = jax.lax.broadcasted_iota(jnp.int32, (HW, 1), 0) % W

    acc = None
    for kh in range(3):
        for kw in range(3):
            shift = (kh - 1) * W + (kw - 1)
            # Flat shift with zero fill: positions whose source falls outside
            # the image in flat index space are exactly the invalid vertical
            # taps; the remaining invalid horizontal taps are killed by the
            # column mask below.  No xe scratch, no full-image zero store.
            if shift == 0:
                piece = xb
            elif shift > 0:
                piece = jnp.concatenate(
                    [xb[shift:], jnp.zeros((shift, cin), jnp.bfloat16)],
                    axis=0)
            else:
                piece = jnp.concatenate(
                    [jnp.zeros((-shift, cin), jnp.bfloat16), xb[:HW + shift]],
                    axis=0)
            if kw == 0:       # left neighbour is invalid in column 0
                piece = jnp.where(col >= 1, piece, 0.0)
            elif kw == 2:     # right neighbour is invalid in column W-1
                piece = jnp.where(col <= W - 2, piece, 0.0)

            # Streamed operand = (HW, Cin) spatial rows, stationary operand =
            # small (Cin, Cout_pad) per-tap weight slab; f32 accumulation.
            d = jnp.dot(piece, w_ref[kh * 3 + kw],
                        preferred_element_type=jnp.float32)
            acc = d if acc is None else acc + d

    out_ref[0] = (acc + b_ref[...]).astype(out_ref.dtype)


def _fused_conv3x3_pallas(x_hwc, w_fused, b_fused, H, W):
    """x_hwc: (N, H*W, Cin) f32; w_fused: (9, Cin, Cout_pad) bf16; b_fused: (1, Cout_pad) f32."""
    N, HW, cin = x_hwc.shape
    cout_pad = w_fused.shape[-1]

    kernel = functools.partial(_fused_conv3x3_kernel, H=H, W=W)

    # TODO(synk): for very large feature maps (where the double-buffered
    # (HW, Cin) input block alone stresses v7x's 64 MiB VMEM), add a grid axis
    # over row tiles with a 1-row halo; also block small images over batch to
    # amortize per-grid-step overhead.
    return pl.pallas_call(
        kernel,
        out_shape=jax.ShapeDtypeStruct((N, HW, cout_pad), x_hwc.dtype),
        grid_spec=pltpu.PrefetchScalarGridSpec(
            num_scalar_prefetch=0,
            grid=(N,),
            in_specs=[
                pl.BlockSpec((1, HW, cin), lambda n: (n, 0, 0)),
                pl.BlockSpec((9, cin, cout_pad), lambda n: (0, 0, 0)),
                pl.BlockSpec((1, cout_pad), lambda n: (0, 0)),
            ],
            out_specs=pl.BlockSpec((1, HW, cout_pad), lambda n: (n, 0, 0)),
        ),
        compiler_params=pltpu.CompilerParams(
            dimension_semantics=("parallel",),
            vmem_limit_bytes=48 * 1024 * 1024,
        ),
    )(x_hwc, w_fused, b_fused)


class ExportLayerPallas:
    """JAX/Pallas port of ExportLayer. Params are deterministic (PRNGKey)."""

    def __init__(self, in_channels, num_classes, key=None):
        if key is None:
            key = jax.random.PRNGKey(0)
        k1, k2, k3, k4 = jax.random.split(key, 4)
        fan_in = in_channels * 3 * 3
        bound = 1.0 / jnp.sqrt(fan_in)  # nn.Conv2d default init range
        self.in_channels = in_channels
        self.loc_out = 4 * 4
        self.conf_out = num_classes * 4
        cout_total = self.loc_out + self.conf_out
        self.cout_pad = _round_up(cout_total, 128)

        # Per-head f32 weights in HWIO (also used by the reference conv check).
        self.w_loc = jax.random.uniform(
            k1, (3, 3, in_channels, self.loc_out), jnp.float32, -bound, bound)
        self.b_loc = jax.random.uniform(
            k2, (self.loc_out,), jnp.float32, -bound, bound)
        self.w_conf = jax.random.uniform(
            k3, (3, 3, in_channels, self.conf_out), jnp.float32, -bound, bound)
        self.b_conf = jax.random.uniform(
            k4, (self.conf_out,), jnp.float32, -bound, bound)

        # Fused kernel params: concat heads along Cout, zero-pad Cout to a
        # lane multiple (kept resident on the MXU as the stationary operand),
        # store taps major so each tap is its own aligned (Cin, Cout_pad)
        # slab, and cast weights to bf16 (accumulation stays f32 in-kernel).
        w_cat = jnp.concatenate([self.w_loc, self.w_conf], axis=-1)
        w_cat = jnp.pad(
            w_cat, ((0, 0), (0, 0), (0, 0), (0, self.cout_pad - cout_total)))
        self.w_fused = w_cat.reshape(
            9, in_channels, self.cout_pad).astype(jnp.bfloat16)
        b_cat = jnp.concatenate([self.b_loc, self.b_conf])
        self.b_fused = jnp.pad(
            b_cat, (0, self.cout_pad - cout_total)).reshape(1, self.cout_pad)

    @functools.partial(jax.jit, static_argnums=0)
    def __call__(self, x_nchw):
        N, C, H, W = x_nchw.shape
        # Layout plumbing: present a spatial-major (HW, Cin) operand so the
        # kernel streams HW rows against the resident weight slabs.
        x_hwc = jnp.transpose(x_nchw, (0, 2, 3, 1)).reshape(N, H * W, C)
        fused = _fused_conv3x3_pallas(x_hwc, self.w_fused, self.b_fused, H, W)
        loc = fused[:, :, :self.loc_out]
        conf = fused[:, :, self.loc_out:self.loc_out + self.conf_out]
        loc = jnp.transpose(loc, (0, 2, 1)).reshape(N, self.loc_out, H, W)
        conf = jnp.transpose(conf, (0, 2, 1)).reshape(N, self.conf_out, H, W)
        return loc, conf


def _conv_ref_nchw(x_nchw, w_hwio, bias):
    """Pure-JAX reference (lax conv) for correctness checking."""
    w_oihw = jnp.transpose(w_hwio, (3, 2, 0, 1))
    y = jax.lax.conv_general_dilated(
        x_nchw, w_oihw, window_strides=(1, 1), padding=((1, 1), (1, 1)),
        dimension_numbers=("NCHW", "OIHW", "NCHW"))
    return y + bias.reshape(1, -1, 1, 1)


if __name__ == "__main__":
    in_channels = 4
    num_classes = 3
    N, H, W = 2, 16, 16

    key = jax.random.PRNGKey(0)
    kx, kp = jax.random.split(key)
    x = jax.random.normal(kx, (N, in_channels, H, W), jnp.float32)

    layer = ExportLayerPallas(in_channels, num_classes, key=kp)
    loc, conf = layer(x)
    jax.block_until_ready((loc, conf))

    # Sanity check against the pure-JAX f32 reference conv.  Kernel operands
    # are bf16 (f32 accumulation), so the tolerance is relaxed accordingly.
    loc_ref = _conv_ref_nchw(x, layer.w_loc, layer.b_loc)
    conf_ref = _conv_ref_nchw(x, layer.w_conf, layer.b_conf)
    assert loc.shape == (N, 16, H, W)
    assert conf.shape == (N, num_classes * 4, H, W)
    assert jnp.allclose(loc, loc_ref, atol=2e-2, rtol=2e-2)
    assert jnp.allclose(conf, conf_ref, atol=2e-2, rtol=2e-2)

    print("KERNEL_OK")
</pallas_src>

<mosaic_0001>
module attributes {stable_mosaic.version = 11 : i64} {
  func.func @_fused_conv3x3_kernel(%arg0: i32, %arg1: memref<1x256x4xf32, #tpu.memory_space<vmem>>, %arg2: memref<9x4x128xbf16, #tpu.memory_space<vmem>>, %arg3: memref<1x128xf32, #tpu.memory_space<vmem>>, %arg4: memref<1x256x128xf32, #tpu.memory_space<vmem>>) attributes {dimension_semantics = [#tpu.dimension_semantics<parallel>], iteration_bounds = array<i64: 2>, scalar_prefetch = 0 : i64, scratch_operands = 0 : i64, tpu.core_type = #tpu.core_type<tc>, window_params = [{transform_indices = @transform_0, window_bounds = array<i64: 1, 256, 4>}, {pipeline_mode = #tpu.pipeline_mode<synchronous>, transform_indices = @transform_1, window_bounds = array<i64: 9, 4, 128>}, {pipeline_mode = #tpu.pipeline_mode<synchronous>, transform_indices = @transform_2, window_bounds = array<i64: 1, 128>}, {transform_indices = @transform_3, window_bounds = array<i64: 1, 256, 128>}]} {
    %c0 = arith.constant 0 : index
    %c0_0 = arith.constant 0 : index
    %c0_1 = arith.constant 0 : index
    %0 = vector.load %arg1[%c0, %c0_0, %c0_1] : memref<1x256x4xf32, #tpu.memory_space<vmem>>, vector<1x256x4xf32>
    %1 = vector.shape_cast %0 : vector<1x256x4xf32> to vector<256x4xf32>
    %2 = arith.truncf %1 : vector<256x4xf32> to vector<256x4xbf16>
    %3 = tpu.iota {dimensions = array<i32: 0>} : vector<256x1xi32>
    %c16_i32 = arith.constant 16 : i32
    %c0_i32 = arith.constant 0 : i32
    %4 = arith.cmpi eq, %c16_i32, %c0_i32 : i32
    %c1_i32 = arith.constant 1 : i32
    %5 = arith.select %4, %c1_i32, %c16_i32 : i32
    %6 = vector.broadcast %5 : i32 to vector<256x1xi32>
    %7 = arith.remsi %3, %6 : vector<256x1xi32>
    %c0_i32_2 = arith.constant 0 : i32
    %8 = vector.broadcast %c0_i32_2 : i32 to vector<256x1xi32>
    %9 = arith.cmpi ne, %7, %8 : vector<256x1xi32>
    %c0_i32_3 = arith.constant 0 : i32
    %10 = vector.broadcast %c0_i32_3 : i32 to vector<256x1xi32>
    %11 = arith.cmpi slt, %7, %10 : vector<256x1xi32>
    %c0_i32_4 = arith.constant 0 : i32
    %12 = arith.cmpi slt, %5, %c0_i32_4 : i32
    %13 = vector.broadcast %12 : i1 to vector<256x1xi1>
    %14 = vector.broadcast %13 : vector<256x1xi1> to vector<256x1xi1>
    %15 = arith.xori %11, %14 : vector<256x1xi1>
    %16 = arith.andi %15, %9 : vector<256x1xi1>
    %17 = vector.broadcast %5 : i32 to vector<256x1xi32>
    %18 = arith.addi %7, %17 : vector<256x1xi32>
    %19 = arith.select %16, %18, %7 : vector<256x1xi1>, vector<256x1xi32>
    %cst = arith.constant 0.000000e+00 : bf16
    %20 = vector.broadcast %cst : bf16 to vector<17x4xbf16>
    %21 = vector.extract_strided_slice %2 {offsets = [0, 0], sizes = [239, 4], strides = [1, 1]} : vector<256x4xbf16> to vector<239x4xbf16>
    %22 = tpu.concatenate %20, %21 in 0 : vector<17x4xbf16>, vector<239x4xbf16> -> vector<256x4xbf16>
    %c1_i32_5 = arith.constant 1 : i32
    %23 = vector.broadcast %c1_i32_5 : i32 to vector<256x1xi32>
    %24 = arith.cmpi sge, %19, %23 : vector<256x1xi32>
    %cst_6 = arith.constant 0.000000e+00 : f32
    %25 = arith.truncf %cst_6 : f32 to bf16
    %26 = vector.shape_cast %24 : vector<256x1xi1> to vector<256x1xi1>
    %27 = vector.broadcast %26 : vector<256x1xi1> to vector<256x4xi1>
    %28 = vector.broadcast %25 : bf16 to vector<256x4xbf16>
    %29 = arith.select %27, %22, %28 : vector<256x4xi1>, vector<256x4xbf16>
    %c0_7 = arith.constant 0 : index
    %c0_8 = arith.constant 0 : index
    %c0_9 = arith.constant 0 : index
    %30 = vector.load %arg2[%c0_7, %c0_8, %c0_9] : memref<9x4x128xbf16, #tpu.memory_space<vmem>>, vector<1x4x128xbf16>
    %31 = vector.shape_cast %30 : vector<1x4x128xbf16> to vector<4x128xbf16>
    %cst_10 = arith.constant dense<0.000000e+00> : vector<256x128xf32>
    %32 = tpu.matmul %29, %31, %cst_10 {dimension_numbers = #tpu.dot_dimension_numbers<[1], [0], [0], [1], [0, 0, 1, 1], [], []>} : vector<256x4xbf16>, vector<4x128xbf16>, vector<256x128xf32> -> vector<256x128xf32>
    %cst_11 = arith.constant 0.000000e+00 : bf16
    %33 = vector.broadcast %cst_11 : bf16 to vector<16x4xbf16>
    %34 = vector.extract_strided_slice %2 {offsets = [0, 0], sizes = [240, 4], strides = [1, 1]} : vector<256x4xbf16> to vector<240x4xbf16>
    %35 = tpu.concatenate %33, %34 in 0 : vector<16x4xbf16>, vector<240x4xbf16> -> vector<256x4xbf16>
    %c1 = arith.constant 1 : index
    %c0_12 = arith.constant 0 : index
    %c0_13 = arith.constant 0 : index
    %36 = vector.load %arg2[%c1, %c0_12, %c0_13] : memref<9x4x128xbf16, #tpu.memory_space<vmem>>, vector<1x4x128xbf16>
    %37 = vector.shape_cast %36 : vector<1x4x128xbf16> to vector<4x128xbf16>
    %cst_14 = arith.constant dense<0.000000e+00> : vector<256x128xf32>
    %38 = tpu.matmul %35, %37, %cst_14 {dimension_numbers = #tpu.dot_dimension_numbers<[1], [0], [0], [1], [0, 0, 1, 1], [], []>} : vector<256x4xbf16>, vector<4x128xbf16>, vector<256x128xf32> -> vector<256x128xf32>
    %39 = arith.addf %32, %38 : vector<256x128xf32>
    %cst_15 = arith.constant 0.000000e+00 : bf16
    %40 = vector.broadcast %cst_15 : bf16 to vector<15x4xbf16>
    %41 = vector.extract_strided_slice %2 {offsets = [0, 0], sizes = [241, 4], strides = [1, 1]} : vector<256x4xbf16> to vector<241x4xbf16>
    %42 = tpu.concatenate %40, %41 in 0 : vector<15x4xbf16>, vector<241x4xbf16> -> vector<256x4xbf16>
    %c14_i32 = arith.constant 14 : i32
    %43 = vector.broadcast %c14_i32 : i32 to vector<256x1xi32>
    %44 = arith.cmpi sle, %19, %43 : vector<256x1xi32>
    %cst_16 = arith.constant 0.000000e+00 : f32
    %45 = arith.truncf %cst_16 : f32 to bf16
    %46 = vector.shape_cast %44 : vector<256x1xi1> to vector<256x1xi1>
    %47 = vector.broadcast %46 : vector<256x1xi1> to vector<256x4xi1>
    %48 = vector.broadcast %45 : bf16 to vector<256x4xbf16>
    %49 = arith.select %47, %42, %48 : vector<256x4xi1>, vector<256x4xbf16>
    %c2 = arith.constant 2 : index
    %c0_17 = arith.constant 0 : index
    %c0_18 = arith.constant 0 : index
    %50 = vector.load %arg2[%c2, %c0_17, %c0_18] : memref<9x4x128xbf16, #tpu.memory_space<vmem>>, vector<1x4x128xbf16>
    %51 = vector.shape_cast %50 : vector<1x4x128xbf16> to vector<4x128xbf16>
    %cst_19 = arith.constant dense<0.000000e+00> : vector<256x128xf32>
    %52 = tpu.matmul %49, %51, %cst_19 {dimension_numbers = #tpu.dot_dimension_numbers<[1], [0], [0], [1], [0, 0, 1, 1], [], []>} : vector<256x4xbf16>, vector<4x128xbf16>, vector<256x128xf32> -> vector<256x128xf32>
    %53 = arith.addf %39, %52 : vector<256x128xf32>
    %cst_20 = arith.constant 0.000000e+00 : bf16
    %54 = vector.broadcast %cst_20 : bf16 to vector<1x4xbf16>
    %55 = vector.extract_strided_slice %2 {offsets = [0, 0], sizes = [255, 4], strides = [1, 1]} : vector<256x4xbf16> to vector<255x4xbf16>
    %56 = tpu.concatenate %54, %55 in 0 : vector<1x4xbf16>, vector<255x4xbf16> -> vector<256x4xbf16>
    %c1_i32_21 = arith.constant 1 : i32
    %57 = vector.broadcast %c1_i32_21 : i32 to vector<256x1xi32>
    %58 = arith.cmpi sge, %19, %57 : vector<256x1xi32>
    %cst_22 = arith.constant 0.000000e+00 : f32
    %59 = arith.truncf %cst_22 : f32 to bf16
    %60 = vector.shape_cast %58 : vector<256x1xi1> to vector<256x1xi1>
    %61 = vector.broadcast %60 : vector<256x1xi1> to vector<256x4xi1>
    %62 = vector.broadcast %59 : bf16 to vector<256x4xbf16>
    %63 = arith.select %61, %56, %62 : vector<256x4xi1>, vector<256x4xbf16>
    %c3 = arith.constant 3 : index
    %c0_23 = arith.constant 0 : index
    %c0_24 = arith.constant 0 : index
    %64 = vector.load %arg2[%c3, %c0_23, %c0_24] : memref<9x4x128xbf16, #tpu.memory_space<vmem>>, vector<1x4x128xbf16>
    %65 = vector.shape_cast %64 : vector<1x4x128xbf16> to vector<4x128xbf16>
    %cst_25 = arith.constant dense<0.000000e+00> : vector<256x128xf32>
    %66 = tpu.matmul %63, %65, %cst_25 {dimension_numbers = #tpu.dot_dimension_numbers<[1], [0], [0], [1], [0, 0, 1, 1], [], []>} : vector<256x4xbf16>, vector<4x128xbf16>, vector<256x128xf32> -> vector<256x128xf32>
    %67 = arith.addf %53, %66 : vector<256x128xf32>
    %c4 = arith.constant 4 : index
    %c0_26 = arith.constant 0 : index
    %c0_27 = arith.constant 0 : index
    %68 = vector.load %arg2[%c4, %c0_26, %c0_27] : memref<9x4x128xbf16, #tpu.memory_space<vmem>>, vector<1x4x128xbf16>
    %69 = vector.shape_cast %68 : vector<1x4x128xbf16> to vector<4x128xbf16>
    %cst_28 = arith.constant dense<0.000000e+00> : vector<256x128xf32>
    %70 = tpu.matmul %2, %69, %cst_28 {dimension_numbers = #tpu.dot_dimension_numbers<[1], [0], [0], [1], [0, 0, 1, 1], [], []>} : vector<256x4xbf16>, vector<4x128xbf16>, vector<256x128xf32> -> vector<256x128xf32>
    %71 = arith.addf %67, %70 : vector<256x128xf32>
    %72 = vector.extract_strided_slice %2 {offsets = [1, 0], sizes = [255, 4], strides = [1, 1]} : vector<256x4xbf16> to vector<255x4xbf16>
    %cst_29 = arith.constant 0.000000e+00 : bf16
    %73 = vector.broadcast %cst_29 : bf16 to vector<1x4xbf16>
    %74 = tpu.concatenate %72, %73 in 0 : vector<255x4xbf16>, vector<1x4xbf16> -> vector<256x4xbf16>
    %c14_i32_30 = arith.constant 14 : i32
    %75 = vector.broadcast %c14_i32_30 : i32 to vector<256x1xi32>
    %76 = arith.cmpi sle, %19, %75 : vector<256x1xi32>
    %cst_31 = arith.constant 0.000000e+00 : f32
    %77 = arith.truncf %cst_31 : f32 to bf16
    %78 = vector.shape_cast %76 : vector<256x1xi1> to vector<256x1xi1>
    %79 = vector.broadcast %78 : vector<256x1xi1> to vector<256x4xi1>
    %80 = vector.broadcast %77 : bf16 to vector<256x4xbf16>
    %81 = arith.select %79, %74, %80 : vector<256x4xi1>, vector<256x4xbf16>
    %c5 = arith.constant 5 : index
    %c0_32 = arith.constant 0 : index
    %c0_33 = arith.constant 0 : index
    %82 = vector.load %arg2[%c5, %c0_32, %c0_33] : memref<9x4x128xbf16, #tpu.memory_space<vmem>>, vector<1x4x128xbf16>
    %83 = vector.shape_cast %82 : vector<1x4x128xbf16> to vector<4x128xbf16>
    %cst_34 = arith.constant dense<0.000000e+00> : vector<256x128xf32>
    %84 = tpu.matmul %81, %83, %cst_34 {dimension_numbers = #tpu.dot_dimension_numbers<[1], [0], [0], [1], [0, 0, 1, 1], [], []>} : vector<256x4xbf16>, vector<4x128xbf16>, vector<256x128xf32> -> vector<256x128xf32>
    %85 = arith.addf %71, %84 : vector<256x128xf32>
    %86 = vector.extract_strided_slice %2 {offsets = [15, 0], sizes = [241, 4], strides = [1, 1]} : vector<256x4xbf16> to vector<241x4xbf16>
    %cst_35 = arith.constant 0.000000e+00 : bf16
    %87 = vector.broadcast %cst_35 : bf16 to vector<15x4xbf16>
    %88 = tpu.concatenate %86, %87 in 0 : vector<241x4xbf16>, vector<15x4xbf16> -> vector<256x4xbf16>
    %c1_i32_36 = arith.constant 1 : i32
    %89 = vector.broadcast %c1_i32_36 : i32 to vector<256x1xi32>
    %90 = arith.cmpi sge, %19, %89 : vector<256x1xi32>
    %cst_37 = arith.constant 0.000000e+00 : f32
    %91 = arith.truncf %cst_37 : f32 to bf16
    %92 = vector.shape_cast %90 : vector<256x1xi1> to vector<256x1xi1>
    %93 = vector.broadcast %92 : vector<256x1xi1> to vector<256x4xi1>
    %94 = vector.broadcast %91 : bf16 to vector<256x4xbf16>
    %95 = arith.select %93, %88, %94 : vector<256x4xi1>, vector<256x4xbf16>
    %c6 = arith.constant 6 : index
    %c0_38 = arith.constant 0 : index
    %c0_39 = arith.constant 0 : index
    %96 = vector.load %arg2[%c6, %c0_38, %c0_39] : memref<9x4x128xbf16, #tpu.memory_space<vmem>>, vector<1x4x128xbf16>
    %97 = vector.shape_cast %96 : vector<1x4x128xbf16> to vector<4x128xbf16>
    %cst_40 = arith.constant dense<0.000000e+00> : vector<256x128xf32>
    %98 = tpu.matmul %95, %97, %cst_40 {dimension_numbers = #tpu.dot_dimension_numbers<[1], [0], [0], [1], [0, 0, 1, 1], [], []>} : vector<256x4xbf16>, vector<4x128xbf16>, vector<256x128xf32> -> vector<256x128xf32>
    %99 = arith.addf %85, %98 : vector<256x128xf32>
    %100 = vector.extract_strided_slice %2 {offsets = [16, 0], sizes = [240, 4], strides = [1, 1]} : vector<256x4xbf16> to vector<240x4xbf16>
    %cst_41 = arith.constant 0.000000e+00 : bf16
    %101 = vector.broadcast %cst_41 : bf16 to vector<16x4xbf16>
    %102 = tpu.concatenate %100, %101 in 0 : vector<240x4xbf16>, vector<16x4xbf16> -> vector<256x4xbf16>
    %c7 = arith.constant 7 : index
    %c0_42 = arith.constant 0 : index
    %c0_43 = arith.constant 0 : index
    %103 = vector.load %arg2[%c7, %c0_42, %c0_43] : memref<9x4x128xbf16, #tpu.memory_space<vmem>>, vector<1x4x128xbf16>
    %104 = vector.shape_cast %103 : vector<1x4x128xbf16> to vector<4x128xbf16>
    %cst_44 = arith.constant dense<0.000000e+00> : vector<256x128xf32>
    %105 = tpu.matmul %102, %104, %cst_44 {dimension_numbers = #tpu.dot_dimension_numbers<[1], [0], [0], [1], [0, 0, 1, 1], [], []>} : vector<256x4xbf16>, vector<4x128xbf16>, vector<256x128xf32> -> vector<256x128xf32>
    %106 = arith.addf %99, %105 : vector<256x128xf32>
    %107 = vector.extract_strided_slice %2 {offsets = [17, 0], sizes = [239, 4], strides = [1, 1]} : vector<256x4xbf16> to vector<239x4xbf16>
    %cst_45 = arith.constant 0.000000e+00 : bf16
    %108 = vector.broadcast %cst_45 : bf16 to vector<17x4xbf16>
    %109 = tpu.concatenate %107, %108 in 0 : vector<239x4xbf16>, vector<17x4xbf16> -> vector<256x4xbf16>
    %c14_i32_46 = arith.constant 14 : i32
    %110 = vector.broadcast %c14_i32_46 : i32 to vector<256x1xi32>
    %111 = arith.cmpi sle, %19, %110 : vector<256x1xi32>
    %cst_47 = arith.constant 0.000000e+00 : f32
    %112 = arith.truncf %cst_47 : f32 to bf16
    %113 = vector.shape_cast %111 : vector<256x1xi1> to vector<256x1xi1>
    %114 = vector.broadcast %113 : vector<256x1xi1> to vector<256x4xi1>
    %115 = vector.broadcast %112 : bf16 to vector<256x4xbf16>
    %116 = arith.select %114, %109, %115 : vector<256x4xi1>, vector<256x4xbf16>
    %c8 = arith.constant 8 : index
    %c0_48 = arith.constant 0 : index
    %c0_49 = arith.constant 0 : index
    %117 = vector.load %arg2[%c8, %c0_48, %c0_49] : memref<9x4x128xbf16, #tpu.memory_space<vmem>>, vector<1x4x128xbf16>
    %118 = vector.shape_cast %117 : vector<1x4x128xbf16> to vector<4x128xbf16>
    %cst_50 = arith.constant dense<0.000000e+00> : vector<256x128xf32>
    %119 = tpu.matmul %116, %118, %cst_50 {dimension_numbers = #tpu.dot_dimension_numbers<[1], [0], [0], [1], [0, 0, 1, 1], [], []>} : vector<256x4xbf16>, vector<4x128xbf16>, vector<256x128xf32> -> vector<256x128xf32>
    %120 = arith.addf %106, %119 : vector<256x128xf32>
    %c0_51 = arith.constant 0 : index
    %c0_52 = arith.constant 0 : index
    %121 = vector.load %arg3[%c0_51, %c0_52] : memref<1x128xf32, #tpu.memory_space<vmem>>, vector<1x128xf32>
    %122 = vector.broadcast %121 : vector<1x128xf32> to vector<256x128xf32>
    %123 = arith.addf %120, %122 : vector<256x128xf32>
    %c0_53 = arith.constant 0 : index
    %c0_54 = arith.constant 0 : index
    %c0_55 = arith.constant 0 : index
    %124 = vector.load %arg4[%c0_53, %c0_54, %c0_55] : memref<1x256x128xf32, #tpu.memory_space<vmem>>, vector<1x256x128xf32>
    %125 = vector.shape_cast %124 : vector<1x256x128xf32> to vector<256x128xf32>
    %126 = vector.shape_cast %123 : vector<256x128xf32> to vector<1x256x128xf32>
    tpu.vector_store %arg4[%c0_53, %c0_54, %c0_55], %126 {strides = array<i32>} : memref<1x256x128xf32, #tpu.memory_space<vmem>>, vector<1x256x128xf32>,
    return
  }
  func.func @transform_0(%arg0: i32) -> (i32, i32, i32) {
    %c0_i32 = arith.constant 0 : i32
    %c0_i32_0 = arith.constant 0 : i32
    %c0_i32_1 = arith.constant 0 : i32
    return %arg0, %c0_i32, %c0_i32_0 : i32, i32, i32
  }
  func.func @transform_1(%arg0: i32) -> (i32, i32, i32) {
    %c0_i32 = arith.constant 0 : i32
    %c0_i32_0 = arith.constant 0 : i32
    %c0_i32_1 = arith.constant 0 : i32
    %c0_i32_2 = arith.constant 0 : i32
    return %c0_i32, %c0_i32_0, %c0_i32_1 : i32, i32, i32
  }
  func.func @transform_2(%arg0: i32) -> (i32, i32) {
    %c0_i32 = arith.constant 0 : i32
    %c0_i32_0 = arith.constant 0 : i32
    %c0_i32_1 = arith.constant 0 : i32
    return %c0_i32, %c0_i32_0 : i32, i32
  }
  func.func @transform_3(%arg0: i32) -> (i32, i32, i32) {
    %c0_i32 = arith.constant 0 : i32
    %c0_i32_0 = arith.constant 0 : i32
    %c0_i32_1 = arith.constant 0 : i32
    return %arg0, %c0_i32, %c0_i32_0 : i32, i32, i32
  }
}

</mosaic_0001>

<bundles_post_ra>
// kernel: a_call__.1
= control target key start
LH: loop header
LB: loop body
LE: loop exit
PB: predicated region body
PF: predicated region fallthrough
CT: control target
= control target key end

     0   :  { %s4523_s12 = smov 0   ;;  %s6121_s0 = inlined_call_operand.vmem [shape: f32[2,256,4], index: 0, kind: input, shape index: {}]   ;;  %s6122_s1 = inlined_call_operand.vmem [shape: bf16[9,4,128], index: 1, kind: input, shape index: {}]   ;;  %s6123_s2 = inlined_call_operand.vmem [shape: f32[1,128], index: 2, kind: input, shape index: {}]   ;;  %s6124_s3 = inlined_call_operand.vmem [shape: f32[2,256,128], index: 3, kind: output, shape index: {}]  }
   0x1 LB: > { %s3561_s13 = sadd.s32 4294967295, %s4499_s12   ;;  %p3565_p0 = scmp.ge.s32.totalorder %s4499_s12, 1  ;;  %s4499_s12 = sphi %s4523_s12, %s13_s12  }
   0x2   : > { %p137_p1 = scmp.lt.s32.totalorder %s4499_s12, 3 }
   0x4   : > { %p138_p2 = pnand %p3565_p0, %p137_p1 }
   0x6   : > { %141 = sbr.rel (%p138_p2) target bundleno = 533 (0x215), region = 32 }
   0xd   : > { %v3585_v0 = vld [vmem:[%s6122_s1 + $0x2] sm:$0x3]  ;;  %vm6133_vm0 = vcmask 1041408   ;;  %v3667_v1 = vld [vmem:[%s6122_s1 + $0x8] sm:$0x3]  ;;  %v222_v2 = vlaneseq  ;;  %p161_p3 = scmp.lt.s32.totalorder %s3561_s13, 1 }
   0xe   : > { %4472 = vmatprep.subr.msk.bf16.mxu1 %vm6133_vm0, %v3585_v0  ;;  %4476 = vmatprep.subr.msk.bf16.mxu0 %vm6133_vm0, %v3667_v1  ;;  %v1047_v3 = vsel %vm6133_vm0, %v3585_v0, 0  ;;  %v4541_v4 = vsel %vm6133_vm0, %v3667_v1, 0  ;;  %v1008_v5 = vld [vmem:[%s6122_s1] sm:$0x3]  ;;  %v3684_v6 = vld [vmem:[%s6122_s1 + $0xa] sm:$0x3] }
   0xf   : > { %6256 = vst [vmem:[#allocation2_spill] sm:$0xff] %v4541_v4  ;;  %3909 = vmatpush3.bf16.msra.mxu1 %v1047_v3  ;;  %4045 = vmatpush3.bf16.msra.mxu0 %v4541_v4  ;;  %v4550_v7 = vshrl.u32 %v222_v2, 7  ;;  %v6147_v8 = vmov 0   ;;  %s6692_s13 = smov (!%p161_p3, %s3561_s13), 1  ;;  %vm6150_vm1 = vcmask 31744   ;;  %v1256_v16 = vsel %vm6133_vm0, %v1008_v5, 0 }
  0x10   : > { %3910 = vmatprep.mubr.bf16.mxu1 %v6147_v8  ;;  %4473 = vmatprep.subr.msk.bf16.mxu1 %vm6133_vm0, %v1008_v5  ;;  %s3753_s22 = sshll.u32 %s6692_s13, 8  ;;  %v2520_v21 = vsel %vm6133_vm0, %v3684_v6, 0  ;;  %vm4502_vm2 = vmmov 1   ;;  %v3701_v26 = vld [vmem:[%s6122_s1 + $0xc] sm:$0x3]  ;;  %v6267_v48 = vmov 0 }
  0x11   : > { %4478 = vmatprep.subr.msk.bf16.mxu0 %vm6133_vm0, %v3684_v6  ;;  %v226_v9 = vadd.s32 24, %v4550_v7  ;;  %s4564_s25 = scalar_lea.vmem %s6121_s0, %s3753_s22  ;;  %v224_v13 = vadd.s32 8, %v4550_v7  ;;  %vm4587_vm3 = vmpackc.low %vm4502_vm2, %vm4502_vm2  ;;  %v4604_v30 = vld [vmem:[%s6122_s1 + $0x4] sm:$0x3]  ;;  %v228_v34 = vadd.s32 40, %v4550_v7  ;;  %v230_v40 = vadd.s32 56, %v4550_v7  ;;  %s6052_s17 = scalar_lea.vmem %s6124_s3, %s3753_s22 }
  0x12   : > { %v174_v10 = vld [vmem:[%s4564_s25] sm:$0xff]  ;;  %v175_v11 = vld [vmem:[%s4564_s25 + $0x8] sm:$0xff]  ;;  %v176_v12 = vld [vmem:[%s4564_s25 + $0x10] sm:$0xff]  ;;  %v4622_v37 = vsel %vm4587_vm3, 65537, %v6147_v8  ;;  %vm6136_vm6 = vsmask.f32 7424 }
  0x13   : > { %v280_v14 = vand.u32 15, %v226_v9  ;;  %v4570_v15 = vpack.c.bf16 %v175_v11, %v174_v10  ;;  %v177_v17 = vld [vmem:[%s4564_s25 + $0x18] sm:$0xff]  ;;  %v178_v18 = vld [vmem:[%s4564_s25 + $0x20] sm:$0xff]  ;;  %v179_v19 = vld [vmem:[%s4564_s25 + $0x28] sm:$0xff]  ;;  %v266_v27 = vand.u32 15, %v224_v13  ;;  %v294_v46 = vand.u32 15, %v228_v34 }
  0x14   : > { %v4576_v20 = vpack.c.bf16 %v177_v17, %v176_v12  ;;  %v4579_v22 = vpack.c.bf16 %v179_v19, %v178_v18  ;;  %v180_v31 = vld [vmem:[%s4564_s25 + $0x30] sm:$0xff]  ;;  %v181_v32 = vld [vmem:[%s4564_s25 + $0x38] sm:$0xff]  ;;  %v182_v35 = vld [vmem:[%s4564_s25 + $0x40] sm:$0xff]  ;;  %v308_v49 = vand.u32 15, %v230_v40  ;;  %v232_v50 = vadd.s32 72, %v4550_v7 }
  0x15   : > { %3911 = vmatmul.mubr.msk.bf16.vlgmr.msra.gmra.mrb[0].mxu1 %vm6150_vm1, %v4570_v15  ;;  %4046 = vmatprep.mubr.msk.bf16.mxu0 %vm6150_vm1, %v4570_v15  ;;  %v641_v23 = vshrl.u32 %v4570_v15, 16  ;;  %v644_v24 = vshll.u32 %v4570_v15, 16  ;;  %vm4597_vm4 = vcmp.le.s32.totalorder %v280_v14, 14  ;;  %v183_v36 = vld [vmem:[%s4564_s25 + $0x48] sm:$0xff]  ;;  %v4636_v41 = vpack.c.bf16 %v181_v32, %v180_v31  ;;  %v184_v52 = vld [vmem:[%s4564_s25 + $0x50] sm:$0xff]  ;;  %v185_v53 = vld [vmem:[%s4564_s25 + $0x58] sm:$0xff] }
  0x16   : > { %6257 = vst [vmem:[#allocation3_spill] sm:$0xff] %v4576_v20  ;;  %6258 = vst [vmem:[#allocation4_spill] sm:$0xff] %v4579_v22  ;;  %3943 = vmatpush3.bf16.msra.mxu1 %v1256_v16  ;;  %4047 = vmatmul.mubr.msk.bf16.vlgmr.msra.gmra.mrb[0].mxu0 %vm6150_vm1, %v4576_v20  ;;  %v651_v28 = vshll.u32 %v4576_v20, 16  ;;  %vm4638_vm7 = vcmp.le.s32.totalorder %v266_v27, 14  ;;  %v4643_v44 = vpack.c.bf16 %v183_v36, %v182_v35  ;;  %vm4670_vm10 = vcmp.le.s32.totalorder %v294_v46, 14  ;;  %v186_v55 = vld [vmem:[%s4564_s25 + $0x60] sm:$0xff] }
  0x17   : > { %4079 = vmatpush3.bf16.msra.mxu0 %v2520_v21  ;;  %3914 = vmatprep.mubr.msk.bf16.mxu1 %vm6150_vm1, %v4576_v20  ;;  %v4612_v33 = vrot.slane %v644_v24, 1  ;;  %vm1587_vm5 = vmpackc.low %vm4597_vm4, %vm4597_vm4  ;;  %6263 = vst [vmem:[#allocation5_spill] sm:$0xff] %v4636_v41  ;;  %v187_v56 = vld [vmem:[%s4564_s25 + $0x68] sm:$0xff]  ;;  %v6143_v58 = vshll.u32 %v4579_v22, 16  ;;  %vm4678_vm11 = vcmp.le.s32.totalorder %v308_v49, 14  ;;  %v322_v60 = vand.u32 15, %v232_v50 }
  0x18   : > { %4050 = vmatprep.mubr.msk.bf16.mxu0 %vm6150_vm1, %v4579_v22  ;;  %4479 = vmatprep.subr.msk.bf16.mxu0 %vm6133_vm0, %v3701_v26  ;;  %v1422_v39 = vrot.slane %v651_v28, 1  ;;  %v1619_v43 = vsel %vm1587_vm5, 65537, %v6147_v8  ;;  %6266 = vst [vmem:[#allocation6_spill] sm:$0xff] %v4643_v44  ;;  %vm1585_vm8 = vmpackc.low %vm4638_vm7, %vm4638_vm7  ;;  %v234_v61 = vadd.s32 88, %v4550_v7  ;;  %v4683_v62 = vpack.c.bf16 %v185_v53, %v184_v52  ;;  %v188_v3 = vld [vmem:[%s4564_s25 + $0x70] sm:$0xff]  ;;  %v189_v6 = vld [vmem:[%s4564_s25 + $0x78] sm:$0xff] }
  0x19   : > { %v1421_v38 = vor.u32 %v4612_v33, %v641_v23  ;;  %4474 = vmatprep.subr.msk.bf16.mxu1 %vm6133_vm0, %v4604_v30  ;;  %v3617_v45 = vcombine.low %v4622_v37, %v1619_v43  ;;  %v1617_v57 = vsel %vm1585_vm8, 65537, %v6147_v8  ;;  %v648_v63 = vshrl.u32 %v4576_v20, 16  ;;  %vm1589_vm12 = vmpackc.low %vm4670_vm10, %vm4670_vm10  ;;  %v190_v9 = vld [vmem:[%s4564_s25 + $0x80] sm:$0xff]  ;;  %v191_v10 = vld [vmem:[%s4564_s25 + $0x88] sm:$0xff] }
  0x1a   : > { %6273 = vst [vmem:[#allocation7_spill] sm:$0xff] %v4683_v62  ;;  %v656_v0 = vshrl.u32 %v4579_v22, 16  ;;  %v6135_v1 = vshll.u32 %v4636_v41, 16  ;;  %v4691_v2 = vpack.c.bf16 %v187_v56, %v186_v55  ;;  %v3616_v5 = vcombine.low %v4622_v37, %v1617_v57  ;;  %v192_v14 = vld [vmem:[%s4564_s25 + $0x90] sm:$0xff]  ;;  %v193_v16 = vld [vmem:[%s4564_s25 + $0x98] sm:$0xff]  ;;  %vm1591_vm13 = vmpackc.low %vm4678_vm11, %vm4678_vm11 }
  0x1b   : > { %v4649_v47 = vsel %vm6136_vm6, %v1421_v38, %v1422_v39  ;;  %vm4654_vm9 = vcmp.ne.s16.totalorder %v3617_v45, 0  ;;  %v1425_v11 = vrot.slane %v6143_v58, 1  ;;  %v4701_v12 = vsel %vm6133_vm0, %v3701_v26, 0  ;;  %v194_v53 = vld [vmem:[%s4564_s25 + $0xa0] sm:$0xff]  ;;  %v195_v54 = vld [vmem:[%s4564_s25 + $0xa8] sm:$0xff] }
  0x1c   : > { %v6268_v48 = vsel %vm4654_vm9, 4294967295, %v6267_v48  ;;  %6274 = vst [vmem:[#allocation8_spill] sm:$0xff] %v4691_v2  ;;  %v236_v13 = vadd.s32 104, %v4550_v7  ;;  %v1621_v17 = vsel %vm1589_vm12, 65537, %v6147_v8  ;;  %vm4712_vm14 = vcmp.le.s32.totalorder %v322_v60, 14 }
  0x1d   : > { %3915 = vmatmul.mubr.msk.bf16.gmra.mrb[4].mxu1 %vm6150_vm1, %v4579_v22  ;;  %v336_v19 = vand.u32 15, %v234_v61  ;;  %v238_v21 = vadd.s32 120, %v4550_v7  ;;  %v4723_v25 = vrot.slane %v641_v23, 7  ;;  %v1424_v26 = vor.u32 %v1422_v39, %v648_v63  ;;  %vm1593_vm2 = vmpackc.low %vm4712_vm14, %vm4712_vm14 }
  0x1e   : > { %4051 = vmatmul.mubr.msk.bf16.gmra.mrb[4].mxu0 %vm6150_vm1, %v4636_v41  ;;  %3918 = vmatprep.mubr.msk.bf16.mxu1 %vm6150_vm1, %v4636_v41  ;;  %v1427_v27 = vor.u32 %v1425_v11, %v656_v0  ;;  %v1428_v29 = vrot.slane %v6135_v1, 1  ;;  %v4733_v31 = vpack.c.bf16 %v189_v6, %v188_v3  ;;  %v4735_v32 = vpack.c.bf16 %v191_v10, %v190_v9 }
  0x1f   : > { %4054 = vmatprep.mubr.msk.bf16.mxu0 %vm6150_vm1, %v4643_v44  ;;  %vm4737_vm15 = vcmp.ne.s16.totalorder %v3616_v5, 0  ;;  %v6279_v23 = vmov 0  ;;  %v6132_v34 = vshll.u32 %v4643_v44, 16  ;;  %v4742_v35 = vpack.c.bf16 %v193_v16, %v192_v14 }
  0x20   : > { %6277 = vst [vmem:[#allocation9_spill] sm:$0xff] %v4733_v31  ;;  %6278 = vst [vmem:[#allocation10_spill] sm:$0xff] %v4735_v32  ;;  %v6280_v23 = vsel %vm4737_vm15, 4294967295, %v6279_v23  ;;  %v3618_v36 = vcombine.low %v4622_v37, %v1621_v17  ;;  %v6142_v38 = vshrl.u32 %v4636_v41, 16  ;;  %v1623_v39 = vsel %vm1591_vm13, 65537, %v6147_v8 }
  0x21   : > { %v6134_v40 = vshrl.u32 %v4643_v44, 16  ;;  %v6130_v42 = vshll.u32 %v4683_v62, 16  ;;  %v350_v43 = vand.u32 15, %v236_v13  ;;  %v225_v45 = vadd.s32 16, %v4550_v7 }
  0x22   : > { %v2453_v46 = vsel %vm4737_vm15, %v4649_v47, 0  ;;  %v4762_v49 = vsel %vm6136_vm6, %v1424_v26, %v1425_v11  ;;  %v4765_v50 = vsel %vm6136_vm6, %v1427_v27, %v1428_v29  ;;  %vm4767_vm3 = vcmp.le.s32.totalorder %v336_v19, 14 }
  0x23   : > { %v1431_v55 = vrot.slane %v6132_v34, 1  ;;  %v1625_v56 = vsel %vm1593_vm2, 65537, %v6147_v8  ;;  %v364_v57 = vand.u32 15, %v238_v21  ;;  %v273_v59 = vand.u32 15, %v225_v45  ;;  %vm1595_vm5 = vmpackc.low %vm4767_vm3, %vm4767_vm3  ;;  %v203_v34 = vld [vmem:[%s4564_s25 + $0xe8] sm:$0xff] }
  0x24   : > { %vm4776_vm4 = vcmp.ne.s16.totalorder %v3618_v36, 0  ;;  %v6283_v60 = vmov 0  ;;  %v1430_v61 = vor.u32 %v1428_v29, %v6142_v38  ;;  %v3619_v3 = vcombine.low %v4622_v37, %v1623_v39 }
  0x25   : > { %3919 = vmatmul.mubr.msk.bf16.gmra.mrb[8].mxu1 %vm6150_vm1, %v4643_v44  ;;  %v6284_v60 = vsel %vm4776_vm4, 4294967295, %v6283_v60  ;;  %v6126_v5 = vshll.u32 %v4691_v2, 16  ;;  %v1433_v6 = vor.u32 %v1431_v55, %v6134_v40  ;;  %v1434_v9 = vrot.slane %v6130_v42, 1  ;;  %v201_v42 = vld [vmem:[%s4564_s25 + $0xd8] sm:$0xff] }
  0x26   : > { %4055 = vmatmul.mubr.msk.bf16.gmra.mrb[8].mxu0 %vm6150_vm1, %v4683_v62  ;;  %3922 = vmatprep.mubr.msk.bf16.mxu1 %vm6150_vm1, %v4683_v62  ;;  %vm4793_vm7 = vcmp.le.s32.totalorder %v350_v43, 14  ;;  %vm779_vm8 = vcmp.ge.s32.totalorder %v273_v59, 1  ;;  %v2454_v11 = vsel %vm4654_vm9, %v4762_v49, 0  ;;  %v4804_v13 = vpack.c.bf16 %v195_v54, %v194_v53 }
  0x27   : > { %4058 = vmatprep.mubr.msk.bf16.mxu0 %vm6150_vm1, %v4691_v2  ;;  %v3620_v14 = vcombine.low %v4622_v37, %v1625_v56  ;;  %v6125_v16 = vshll.u32 %v4733_v31, 16  ;;  %vm873_vm10 = vmpackc.low %vm779_vm8, %vm779_vm8  ;;  %v2455_v17 = vsel %vm4776_vm4, %v4765_v50, 0  ;;  %vm4812_vm11 = vcmp.le.s32.totalorder %v364_v57, 14 }
  0x28   : > { %6287 = vst [vmem:[#allocation11_spill] sm:$0xff] %v4804_v13  ;;  %v903_v19 = vsel %vm873_vm10, 65537, %v6147_v8  ;;  %v240_v21 = vadd.s32 136, %v4550_v7  ;;  %v4819_v26 = vsel %vm6136_vm6, %v1430_v61, %v1431_v55  ;;  %vm4821_vm12 = vcmp.ne.s16.totalorder %v3619_v3, 0  ;;  %vm1597_vm13 = vmpackc.low %vm4793_vm7, %vm4793_vm7 }
  0x29   : > { %v6290_v27 = vmov 0  ;;  %v6131_v29 = vshrl.u32 %v4683_v62, 16  ;;  %v1437_v36 = vrot.slane %v6126_v5, 1  ;;  %v4832_v39 = vsel %vm6136_vm6, %v1433_v6, %v1434_v9  ;;  %vm1599_vm2 = vmpackc.low %vm4812_vm11, %vm4812_vm11 }
  0x2a   : > { %v6291_v27 = vsel %vm4821_vm12, 4294967295, %v6290_v27  ;;  %v1627_v43 = vsel %vm1595_vm5, 65537, %v6147_v8  ;;  %v6128_v45 = vshrl.u32 %v4691_v2, 16  ;;  %vm4845_vm14 = vcmp.ne.s16.totalorder %v3620_v14, 0  ;;  %v4869_v14 = vld [vmem:[%s6122_s1 + $0xe] sm:$0x3] }
  0x2b   : > { %v6292_v53 = vmov 0  ;;  %v1440_v54 = vrot.slane %v6125_v16, 1  ;;  %v6127_v55 = vshrl.u32 %v4733_v31, 16  ;;  %vm774_vm3 = vcmask 1040384  }
  0x2c   : > { %v6293_v53 = vsel %vm4845_vm14, 4294967295, %v6292_v53  ;;  %v3570_v52 = vcombine.low %v903_v19, %v4622_v37  ;;  %v6129_v56 = vshll.u32 %v4735_v32, 16  ;;  %v378_v57 = vand.u32 15, %v240_v21  ;;  %v196_v19 = vld [vmem:[%s4564_s25 + $0xb0] sm:$0xff]  ;;  %v197_v21 = vld [vmem:[%s4564_s25 + $0xb8] sm:$0xff] }
  0x2d   : > { %3923 = vmatmul.mubr.msk.bf16.gmra.mrb[12].mxu1 %vm6150_vm1, %v4691_v2  ;;  %v242_v59 = vadd.s32 152, %v4550_v7  ;;  %v1436_v61 = vor.u32 %v1434_v9, %v6131_v29  ;;  %v3621_v3 = vcombine.low %v4622_v37, %v1627_v43  ;;  %v227_v6 = vadd.s32 32, %v4550_v7  ;;  %v202_v29 = vld [vmem:[%s4564_s25 + $0xe0] sm:$0xff] }
  0x2e   : > { %4059 = vmatmul.mubr.msk.bf16.gmra.mrb[12].mxu0 %vm6150_vm1, %v4733_v31  ;;  %3926 = vmatprep.mubr.msk.bf16.mxu1 %vm6150_vm1, %v4733_v31  ;;  %v1439_v9 = vor.u32 %v1437_v36, %v6128_v45  ;;  %vm6152_vm5 = vsmask.f32 256  ;;  %v229_v43 = vadd.s32 48, %v4550_v7  ;;  %v1442_v16 = vor.u32 %v1440_v54, %v6127_v55 }
  0x2f   : > { %4080 = vmatprep.mubr.msk.bf16.mxu0 %vm6150_vm1, %v2453_v46  ;;  %v4843_v46 = vrot.slane %v648_v63, 7  ;;  %v1629_v63 = vsel %vm1597_vm13, 65537, %v6147_v8  ;;  %vm4890_vm7 = vcmp.ne.s16.totalorder %v3570_v52, 0  ;;  %vm4902_vm8 = vcmp.le.s32.totalorder %v378_v57, 14  ;;  %vm4971_vm13 = vmand %vm774_vm3, %vm6152_vm5 }
  0x30   : > { %v3622_v51 = vcombine.low %v4622_v37, %v1629_v63  ;;  %v392_v52 = vand.u32 15, %v242_v59  ;;  %v287_v45 = vand.u32 15, %v227_v6  ;;  %v2456_v57 = vsel %vm4821_vm12, %v4819_v26, 0 }
  0x31   : > { %v653_v10 = vor.u32 %v651_v28, %v4843_v46  ;;  %v1631_v28 = vsel %vm1599_vm2, 65537, %v6147_v8  ;;  %v2457_v59 = vsel %vm4845_vm14, %v4832_v39, 0  ;;  %vm4925_vm10 = vcmp.ne.s16.totalorder %v3621_v3, 0  ;;  %vm6317_vm14 = vmpackc.low %vm4902_vm8, %vm4902_vm8 }
  0x32   : > { %v6300_v6 = vmov 0  ;;  %v4930_v55 = vsel %vm6136_vm6, %v1439_v9, %v1440_v54  ;;  %vm4932_vm11 = vcmp.ne.s16.totalorder %v3622_v51, 0  ;;  %v646_v54 = vor.u32 %v644_v24, %v4723_v25 }
  0x33   : > { %v4896_v18 = vsel %vm6152_vm5, %v4723_v25, %v653_v10  ;;  %v4909_v10 = vpack.c.bf16 %v197_v21, %v196_v19  ;;  %v4922_v19 = vsel %vm6136_vm6, %v1436_v61, %v1437_v36  ;;  %v301_v21 = vand.u32 15, %v229_v43  ;;  %6302 = vst [vmem:[#allocation14_spill] sm:$0xff] %v4930_v55  ;;  %v199_v61 = vld [vmem:[%s4564_s25 + $0xc8] sm:$0xff]  ;;  %v200_v43 = vld [vmem:[%s4564_s25 + $0xd0] sm:$0xff] }
  0x34   : > { %6296 = vst [vmem:[#allocation12_spill] sm:$0xff] %v4896_v18  ;;  %v6301_v6 = vsel %vm4925_vm10, 4294967295, %v6300_v6  ;;  %v244_v36 = vadd.s32 168, %v4550_v7  ;;  %vm4949_vm2 = vcmp.le.s32.totalorder %v392_v52, 14  ;;  %v246_v9 = vadd.s32 184, %v4550_v7 }
  0x35   : > { %3927 = vmatmul.mubr.msk.bf16.gmra.mrb[16].mxu1 %vm6150_vm1, %v4735_v32  ;;  %6299 = vst [vmem:[#allocation13_spill] sm:$0xff] %v4909_v10  ;;  %v6309_v40 = vmov 0  ;;  %v6146_v1 = vshrl.u32 %v4735_v32, 16  ;;  %v6314_v24 = vmov 0  ;;  %v1633_v25 = vsel %vm6317_vm14, 65537, %v6147_v8  ;;  %vm1603_vm14 = vmpackc.low %vm4949_vm2, %vm4949_vm2 }
  0x36   : > { %4081 = vmatmul.mubr.msk.bf16.vlgmr.msra.gmra.mrb[0].mxu0 %vm6150_vm1, %v2454_v11  ;;  %3930 = vmatprep.mubr.msk.bf16.mxu1 %vm6150_vm1, %v4742_v35  ;;  %v1443_v11 = vrot.slane %v6129_v56, 1  ;;  %v6303_v56 = vmov 0  ;;  %v6315_v24 = vsel %vm4971_vm13, 4294967295, %v6314_v24  ;;  %v6144_v52 = vshll.u32 %v4804_v13, 16 }
  0x37   : > { %4113 = vmatpush3.bf16.msra.mxu0 %v4701_v12  ;;  %4084 = vmatprep.mubr.msk.bf16.mxu0 %vm6150_vm1, %v2455_v17  ;;  %v3623_v12 = vcombine.low %v4622_v37, %v1631_v28  ;;  %v6141_v17 = vshll.u32 %v4742_v35, 16  ;;  %v198_v28 = vld [vmem:[%s4564_s25 + $0xc0] sm:$0xff]  ;;  %v6304_v56 = vsel %vm4932_vm11, 4294967295, %v6303_v56  ;;  %6316 = vst [vmem:[#allocation18_spill] sm:$0xff] %v6315_v24  ;;  %vm4983_vm12 = vcmp.ge.s32.totalorder %v301_v21, 1 }
  0x38   : > { %4480 = vmatprep.subr.msk.bf16.mxu0 %vm6133_vm0, %v4869_v14  ;;  %6305 = vst [vmem:[#allocation15_spill] sm:$0xff] %v6304_v56  ;;  %v4944_v3 = vsel %vm6136_vm6, %v1442_v16, %v1443_v11  ;;  %vm4963_vm6 = vcmp.ge.s32.totalorder %v287_v45, 1  ;;  %v6145_v45 = vshrl.u32 %v4742_v35, 16  ;;  %v4992_v38 = vpack.c.bf16 %v201_v42, %v200_v43  ;;  %vm877_vm8 = vmpackc.low %vm4983_vm12, %vm4983_vm12 }
  0x39   : > { %6306 = vst [vmem:[#allocation16_spill] sm:$0xff] %v4944_v3  ;;  %vm4956_vm0 = vcmp.ne.s16.totalorder %v3623_v12, 0  ;;  %v1446_v16 = vrot.slane %v6141_v17, 1  ;;  %v4990_v17 = vpack.c.bf16 %v199_v61, %v198_v28  ;;  %v406_v63 = vand.u32 15, %v244_v36  ;;  %vm875_vm3 = vmpackc.low %vm4963_vm6, %vm4963_vm6 }
  0x3a   : > { %v6310_v40 = vsel %vm4956_vm0, 4294967295, %v6309_v40  ;;  %6320 = vst [vmem:[#allocation19_spill] sm:$0xff] %v4992_v38  ;;  %v231_v58 = vadd.s32 64, %v4550_v7  ;;  %v5002_v21 = vpack.c.bf16 %v203_v34, %v202_v29  ;;  %v2459_v42 = vsel %vm4932_vm11, %v4930_v55, 0 }
  0x3b   : > { %6311 = vst [vmem:[#allocation17_spill] sm:$0xff] %v6310_v40  ;;  %v420_v28 = vand.u32 15, %v246_v9  ;;  %v1445_v34 = vor.u32 %v1443_v11, %v6146_v1  ;;  %v3624_v29 = vcombine.low %v4622_v37, %v1633_v25  ;;  %v1448_v61 = vor.u32 %v1446_v16, %v6145_v45 }
  0x3c   : > { %v1449_v43 = vrot.slane %v6144_v52, 1  ;;  %v5035_v11 = vrot.slane %v656_v0, 7  ;;  %v905_v9 = vsel %vm875_vm3, 65537, %v6147_v8  ;;  %vm5038_vm6 = vcmp.le.s32.totalorder %v406_v63, 14 }
  0x3d   : > { %3931 = vmatmul.mubr.msk.bf16.gmra.mrb[20].mxu1 %vm6150_vm1, %v4804_v13  ;;  %v315_v25 = vand.u32 15, %v231_v58  ;;  %v233_v12 = vadd.s32 80, %v4550_v7  ;;  %v907_v52 = vsel %vm877_vm8, 65537, %v6147_v8  ;;  %v6149_v45 = vshll.u32 %v4909_v10, 16 }
  0x3e   : > { %4085 = vmatmul.mubr.msk.bf16.gmra.mrb[4].mxu0 %vm6150_vm1, %v2456_v57  ;;  %3934 = vmatprep.mubr.msk.bf16.mxu1 %vm6150_vm1, %v4909_v10  ;;  %v2458_v57 = vsel %vm4925_vm10, %v4922_v19, 0  ;;  %vm5045_vm12 = vcmp.le.s32.totalorder %v420_v28, 14  ;;  %v248_v0 = vadd.s32 200, %v4550_v7  ;;  %vm6326_vm2 = vsmask.f32 7424 }
  0x3f   : > { %4088 = vmatprep.mubr.msk.bf16.mxu0 %vm6150_vm1, %v2457_v59  ;;  %v5015_v59 = vsel %vm4971_vm13, 0, %v646_v54  ;;  %v1635_v54 = vsel %vm1603_vm14, 65537, %v6147_v8  ;;  %v5054_v1 = vsel %vm6326_vm2, %v1445_v34, %v1446_v16  ;;  %vm6328_vm14 = vcmask 1041408   ;;  %vm6332_vm8 = vmmov %vm6326_vm2 }
  0x40   : > { %6321 = vst [vmem:[#allocation20_spill] sm:$0xff] %v5015_v59  ;;  %6327 = vst [vmem:[#allocation21_spill] sm:$0xff] %v5054_v1  ;;  %v5058_v58 = vsel %vm6328_vm14, %v4604_v30, 0  ;;  %v3625_v36 = vcombine.low %v4622_v37, %v1635_v54  ;;  %vm5063_vm3 = vcmp.ne.s16.totalorder %v3624_v29, 0  ;;  %v6329_v28 = vmov 0 }
  0x41   : > { %v6330_v28 = vsel %vm5063_vm3, 4294967295, %v6329_v28  ;;  %v5068_v8 = vsel %vm6332_vm8, %v1448_v61, %v1449_v43  ;;  %v6334_v16 = vshll.u32 %v4579_v22, 16  ;;  %vm1605_vm2 = vmpackc.low %vm5038_vm6, %vm5038_vm6  ;;  %v3571_v30 = vcombine.low %v905_v9, %v4622_v37 }
  0x42   : > { %6331 = vst [vmem:[#allocation22_spill] sm:$0xff] %v6330_v28  ;;  %6333 = vst [vmem:[#allocation23_spill] sm:$0xff] %v5068_v8  ;;  %v3572_v29 = vcombine.low %v907_v52, %v4622_v37  ;;  %vm5085_vm8 = vcmp.ge.s32.totalorder %v315_v25, 1  ;;  %v329_v54 = vand.u32 15, %v233_v12  ;;  %v2461_v52 = vsel %vm5063_vm3, %v5054_v1, 0 }
  0x43   : > { %v661_v34 = vor.u32 %v6334_v16, %v5035_v11  ;;  %vm1607_vm14 = vmpackc.low %vm5045_vm12, %vm5045_vm12  ;;  %v434_v16 = vand.u32 15, %v248_v0  ;;  %vm5097_vm6 = vcmp.ne.s16.totalorder %v3625_v36, 0  ;;  %v6337_v25 = vmov 0 }
  0x44   : > { %v6338_v25 = vsel %vm5097_vm6, 4294967295, %v6337_v25  ;;  %v6340_v51 = vmov 0   ;;  %v6342_v9 = vshrl.u32 %v4804_v13, 16  ;;  %vm879_vm12 = vmpackc.low %vm5085_vm8, %vm5085_vm8  ;;  %v250_v36 = vadd.s32 216, %v4550_v7 }
  0x45   : > { %3935 = vmatmul.mubr.msk.bf16.gmra.mrb[24].mxu1 %vm6150_vm1, %v4990_v17  ;;  %6339 = vst [vmem:[#allocation24_spill] sm:$0xff] %v6338_v25  ;;  %v1637_v12 = vsel %vm1605_vm2, 65537, %v6340_v51  ;;  %v1639_v15 = vsel %vm1607_vm14, 65537, %v6340_v51  ;;  %v6343_v4 = vmov 0  ;;  %vm5119_vm2 = vcmp.ne.s16.totalorder %v3572_v29, 0 }
  0x46   : > { %4089 = vmatmul.mubr.msk.bf16.gmra.mrb[8].mxu0 %vm6150_vm1, %v2458_v57  ;;  %3938 = vmatprep.mubr.msk.bf16.mxu1 %vm6150_vm1, %v4992_v38  ;;  %v1452_v57 = vrot.slane %v6149_v45, 1  ;;  %v5106_v45 = vsel %vm6152_vm5, %v4843_v46, %v661_v34  ;;  %v1451_v0 = vor.u32 %v1449_v43, %v6342_v9  ;;  %vm5123_vm5 = vcmp.ge.s32.totalorder %v329_v54, 1  ;;  %v204_v46 = vld [vmem:[%s4564_s25 + $0xf0] sm:$0xff] }
  0x47   : > { %4092 = vmatprep.mubr.msk.bf16.mxu0 %vm6150_vm1, %v2459_v42  ;;  %v6341_v42 = vshrl.u32 %v4636_v41, 16  ;;  %vm5115_vm1 = vcmp.ne.s16.totalorder %v3571_v30, 0  ;;  %v235_v43 = vadd.s32 96, %v4550_v7  ;;  %v3626_v34 = vcombine.low %v4622_v37, %v1637_v12 }
  0x48   : > { %v6344_v4 = vsel %vm5115_vm1, 4294967295, %v6343_v4  ;;  %v6349_v61 = vshrl.u32 %v4909_v10, 16  ;;  %v6350_v30 = vshll.u32 %v4990_v17, 16  ;;  %vm5133_vm14 = vcmp.le.s32.totalorder %v434_v16, 14 }
  0x49   : > { %v666_v63 = vrot.slane %v6341_v42, 7  ;;  %v6345_v42 = vmov 0  ;;  %v3627_v29 = vcombine.low %v4622_v37, %v1639_v15  ;;  %v6353_v54 = vshll.u32 %v4636_v41, 16 }
  0x4a   : > { %v6346_v42 = vsel %vm5119_vm2, 4294967295, %v6345_v42  ;;  %v1454_v9 = vor.u32 %v1452_v57, %v6349_v61  ;;  %v1455_v22 = vrot.slane %v6350_v30, 1  ;;  %v909_v28 = vsel %vm879_vm12, 65537, %v6340_v51 }
  0x4b   : > { %v669_v20 = vor.u32 %v6353_v54, %v666_v63  ;;  %v6354_v55 = vshrl.u32 %v4643_v44, 16  ;;  %vm6355_vm8 = vcmask 31744   ;;  %v2462_v16 = vsel %vm5097_vm6, %v5068_v8, 0 }
  0x4c   : > { %v994_v15 = vsel %vm5115_vm1, %v4896_v18, 0  ;;  %vm6356_vm3 = vsmask.f32 7424  ;;  %v6358_v30 = vsel %vm4956_vm0, %v4944_v3, 0  ;;  %v6178_v54 = vshrl.u32 %v4990_v17, 16  ;;  %vm6359_vm12 = vmmov %vm6355_vm8  ;;  %v205_v3 = vld [vmem:[%s4564_s25 + $0xf8] sm:$0xff] }
  0x4d   : > { %v5143_v12 = vrot.slane %v6354_v55, 7  ;;  %3939 = vmatmul.mubr.msk.bf16.gmra.mrb[28].mxu1 %vm6355_vm8, %v5002_v21  ;;  %v5154_v61 = vsel %vm6356_vm3, %v1451_v0, %v1452_v57  ;;  %v448_v55 = vand.u32 15, %v250_v36  ;;  %vm1609_vm3 = vmpackc.low %vm5133_vm14, %vm5133_vm14  ;;  %v343_v57 = vand.u32 15, %v235_v43 }
  0x4e   : > { %6357 = vst [vmem:[#allocation25_spill] sm:$0xff] %v5154_v61  ;;  %4093 = vmatmul.mubr.msk.bf16.gmra.mrb[12].mxu0 %vm6355_vm8, %v6358_v30  ;;  %3944 = vmatprep.mubr.bf16.mxu1 %v6340_v51  ;;  %v252_v0 = vadd.s32 232, %v4550_v7  ;;  %vm5175_vm8 = vcmp.ne.s16.totalorder %v3626_v34, 0  ;;  %v6360_v30 = vmov 0  ;;  %vm6363_vm6 = vsmask.f32 7424 }
  0x4f   : > { %4096 = vmatprep.mubr.msk.bf16.mxu0 %vm6359_vm12, %v2461_v52  ;;  %v6361_v30 = vsel %vm5175_vm8, 4294967295, %v6360_v30  ;;  %v5180_v41 = vsel %vm6363_vm6, %v1454_v9, %v1455_v22  ;;  %v3573_v1 = vcombine.low %v909_v28, %v4622_v37  ;;  %vm5183_vm14 = vcmp.ne.s16.totalorder %v3627_v29, 0  ;;  %vm6370_vm6 = vmpackc.low %vm5123_vm5, %vm5123_vm5 }
  0x50   : > { %6362 = vst [vmem:[#allocation26_spill] sm:$0xff] %v6361_v30  ;;  %6364 = vst [vmem:[#allocation27_spill] sm:$0xff] %v5180_v41  ;;  %v6365_v43 = vmov 0  ;;  %vm6368_vm12 = vsmask.f32 256  ;;  %v6369_v36 = vshll.u32 %v4643_v44, 16  ;;  %v1457_v44 = vor.u32 %v1455_v22, %v6178_v54 }
  0x51   : > { %v6366_v43 = vsel %vm5183_vm14, 4294967295, %v6365_v43  ;;  %v5189_v52 = vsel %vm6368_vm12, %v5035_v11, %v669_v20  ;;  %v911_v9 = vsel %vm6370_vm6, 65537, %v6340_v51  ;;  %v1641_v28 = vsel %vm1609_vm3, 65537, %v6340_v51  ;;  %v5255_v22 = vld [vmem:[%s6122_s1 + $0x6] sm:$0x3] }
  0x52   : > { %6367 = vst [vmem:[#allocation28_spill] sm:$0xff] %v6366_v43  ;;  %v677_v34 = vor.u32 %v6369_v36, %v5143_v12  ;;  %vm5201_vm0 = vcmp.le.s32.totalorder %v448_v55, 14  ;;  %v237_v20 = vadd.s32 112, %v4550_v7  ;;  %v462_v11 = vand.u32 15, %v252_v0 }
  0x53   : > { %v6373_v36 = vshll.u32 %v4992_v38, 16  ;;  %vm5210_vm12 = vcmp.ge.s32.totalorder %v343_v57, 1  ;;  %v254_v55 = vadd.s32 248, %v4550_v7  ;;  %vm5217_vm5 = vcmp.ne.s16.totalorder %v3573_v1, 0 }
  0x54   : > { %v6376_v40 = vmov 0  ;;  %v3574_v0 = vcombine.low %v911_v9, %v4622_v37  ;;  %v2463_v57 = vsel %vm5175_vm8, %v5154_v61, 0  ;;  %vm6378_vm3 = vsmask.f32 256 }
  0x55   : > { %v1458_v8 = vrot.slane %v6373_v36, 1  ;;  %v6377_v40 = vsel %vm5217_vm5, 4294967295, %v6376_v40  ;;  %v5228_v36 = vsel %vm6378_vm3, %v666_v63, %v677_v34  ;;  %v3628_v54 = vcombine.low %v4622_v37, %v1641_v28 }
  0x56   : > { %vm5234_vm13 = vcmp.le.s32.totalorder %v462_v11, 14  ;;  %v6381_v9 = vsel %vm4890_vm7, %v5015_v59, 0  ;;  %vm6382_vm11 = vcmask 31744   ;;  %v2464_v63 = vsel %vm5183_vm14, %v5180_v41, 0 }
  0x57   : > { %3945 = vmatmul.mubr.msk.bf16.vlgmr.msra.gmra.mrb[0].mxu1 %vm6382_vm11, %v6381_v9  ;;  %v357_v34 = vand.u32 15, %v237_v20  ;;  %v5249_v28 = vpack.c.bf16 %v205_v3, %v204_v46  ;;  %v239_v11 = vadd.s32 128, %v4550_v7  ;;  %4097 = vmatmul.mubr.msk.bf16.gmra.mrb[16].mxu0 %vm6382_vm11, %v2462_v16  ;;  %v996_v9 = vsel %vm5217_vm5, %v5189_v52, 0  ;;  %vm6386_vm3 = vmmov %vm6382_vm11 }
  0x58   : > { %3977 = vmatpush3.bf16.msra.mxu1 %v5058_v58  ;;  %vm6383_vm6 = vsmask.f32 7424  ;;  %v6385_v3 = vshrl.u32 %v4683_v62, 16  ;;  %v476_v46 = vand.u32 15, %v254_v55  ;;  %3948 = vmatprep.mubr.msk.bf16.mxu1 %vm6386_vm3, %v994_v15  ;;  %vm6387_vm14 = vmmov %vm6386_vm3  ;;  %vm5271_vm8 = vcmp.ne.s16.totalorder %v3574_v0, 0 }
  0x59   : > { %v5263_v24 = vsel %vm6383_vm6, %v1457_v44, %v1458_v8  ;;  %4100 = vmatprep.mubr.msk.bf16.mxu0 %vm6387_vm14, %v2463_v57  ;;  %v6388_v58 = vmov 0  ;;  %v6390_v16 = vshrl.u32 %v4992_v38, 16  ;;  %v6391_v41 = vshll.u32 %v5002_v21, 16  ;;  %vm1613_vm6 = vmpackc.low %vm5234_vm13, %vm5234_vm13 }
  0x5a   : > { %6384 = vst [vmem:[#allocation29_spill] sm:$0xff] %v5263_v24  ;;  %v5267_v20 = vrot.slane %v6385_v3, 7  ;;  %v6389_v58 = vsel %vm5271_vm8, 4294967295, %v6388_v58  ;;  %v371_v3 = vand.u32 15, %v239_v11  ;;  %vm5282_vm11 = vcmp.ne.s16.totalorder %v3628_v54, 0  ;;  %vm6395_vm14 = vmpackc.low %vm5201_vm0, %vm5201_vm0 }
  0x5b   : > { %v1460_v59 = vor.u32 %v1458_v8, %v6390_v16  ;;  %v1461_v44 = vrot.slane %v6391_v41, 1  ;;  %v6392_v55 = vmov 0  ;;  %v1643_v15 = vsel %vm6395_vm14, 65537, %v6340_v51  ;;  %vm6396_vm3 = vmpackc.low %vm5210_vm12, %vm5210_vm12 }
  0x5c   : > { %v6393_v55 = vsel %vm5282_vm11, 4294967295, %v6392_v55  ;;  %v913_v8 = vsel %vm6396_vm3, 65537, %v6340_v51  ;;  %v259_v41 = vand.u32 15, %v4550_v7  ;;  %vm6397_vm13 = vcmask 1041408  }
  0x5d   : > { %6394 = vst [vmem:[#allocation30_spill] sm:$0xff] %v6393_v55  ;;  %4475 = vmatprep.subr.msk.bf16.mxu1 %vm6397_vm13, %v5255_v22  ;;  %vm5301_vm10 = vcmp.ge.s32.totalorder %v357_v34, 1  ;;  %v241_v57 = vadd.s32 144, %v4550_v7  ;;  %v6400_v25 = vshll.u32 %v4683_v62, 16  ;;  %v6401_v11 = vshrl.u32 %v4691_v2, 16 }
  0x5e   : > { %v1645_v43 = vsel %vm1613_vm6, 65537, %v6340_v51  ;;  %vm5316_vm0 = vcmp.le.s32.totalorder %v476_v46, 14  ;;  %v3629_v29 = vcombine.low %v4622_v37, %v1643_v15  ;;  %v3575_v0 = vcombine.low %v913_v8, %v4622_v37 }
  0x5f   : > { %v685_v1 = vor.u32 %v6400_v25, %v5267_v20  ;;  %v5313_v16 = vrot.slane %v6401_v11, 7  ;;  %vm5322_vm12 = vcmp.ge.s32.totalorder %v371_v3, 1  ;;  %v243_v25 = vadd.s32 160, %v4550_v7  ;;  %vm6424_vm4 = vmpackc.low %vm5316_vm0, %vm5316_vm0 }
  0x60   : > { %v997_v11 = vsel %vm5271_vm8, %v5228_v36, 0  ;;  %v2465_v46 = vsel %vm5282_vm11, %v5263_v24, 0  ;;  %vm5336_vm14 = vcmp.ge.s32.totalorder %v259_v41, 1  ;;  %v6408_v3 = vsel %vm5119_vm2, %v5106_v45, 0  ;;  %vm887_vm13 = vmpackc.low %vm5322_vm12, %vm5322_vm12 }
  0x61   : > { %vm6409_vm3 = vcmask 31744   ;;  %v6410_v8 = vshrl.u32 %v5002_v21, 16  ;;  %v6411_v55 = vshll.u32 %v5249_v28, 16  ;;  %v3630_v30 = vcombine.low %v4622_v37, %v1645_v43  ;;  %vm1980_vm12 = vmpackc.low %vm5336_vm14, %vm5336_vm14 }
  0x62   : > { %3949 = vmatmul.mubr.msk.bf16.gmra.mrb[4].mxu1 %vm6409_vm3, %v6408_v3  ;;  %v385_v41 = vand.u32 15, %v241_v57  ;;  %vm6412_vm6 = vmmov %vm6409_vm3  ;;  %vm6414_vm9 = vsmask.f32 7424  ;;  %v399_v61 = vand.u32 15, %v243_v25  ;;  %v245_v54 = vadd.s32 176, %v4550_v7 }
  0x63   : > { %v1463_v62 = vor.u32 %v1461_v44, %v6410_v8  ;;  %v1467_v24 = vrot.slane %v6411_v55, 1  ;;  %4101 = vmatmul.mubr.msk.bf16.gmra.mrb[20].mxu0 %vm6412_vm6, %v2464_v63  ;;  %vm6413_vm11 = vmmov %vm6409_vm3  ;;  %v5356_v56 = vsel %vm6414_vm9, %v1460_v59, %v1461_v44  ;;  %vm6416_vm3 = vsmask.f32 256 }
  0x64   : > { %3952 = vmatprep.mubr.msk.bf16.mxu1 %vm6413_vm11, %v996_v9  ;;  %6415 = vst [vmem:[#allocation31_spill] sm:$0xff] %v5356_v56  ;;  %v5360_v3 = vsel %vm6416_vm3, %v5143_v12, %v685_v1  ;;  %v6417_v55 = vshll.u32 %v4691_v2, 16  ;;  %v6210_v8 = vshrl.u32 %v5249_v28, 16  ;;  %4104 = vmatprep.mubr.msk.bf16.mxu0 %vm6412_vm6, %v2465_v46  ;;  %vm5370_vm11 = vcmp.ne.s16.totalorder %v3629_v29, 0  ;;  %vm6423_vm3 = vmpackc.low %vm5301_vm10, %vm5301_vm10 }
  0x65   : > { %v6418_v63 = vmov 0  ;;  %vm5374_vm9 = vcmp.ne.s16.totalorder %v3575_v0, 0  ;;  %v6421_v59 = vmov 0  ;;  %v915_v12 = vsel %vm6423_vm3, 65537, %v6340_v51 }
  0x66   : > { %v693_v43 = vor.u32 %v6417_v55, %v5313_v16  ;;  %v6419_v63 = vsel %vm5370_vm11, 4294967295, %v6418_v63  ;;  %v6422_v59 = vsel %vm5374_vm9, 4294967295, %v6421_v59  ;;  %vm1485_vm6 = vcmask 1047552  }
  0x67   : > { %6420 = vst [vmem:[#allocation32_spill] sm:$0xff] %v6419_v63  ;;  %v1647_v9 = vsel %vm6424_vm4, 65537, %v6340_v51  ;;  %v6425_v44 = vshrl.u32 %v4733_v31, 16  ;;  %vm6426_vm10 = vsmask.f32 7424  ;;  %vm5399_vm3 = vcmp.ne.s16.totalorder %v3630_v30, 0 }
  0x68   : > { %v5397_v0 = vsel %vm6426_vm10, %v1463_v62, %v1467_v24  ;;  %v6428_v57 = vmov 0  ;;  %v917_v1 = vsel %vm887_vm13, 65537, %v6340_v51  ;;  %vm5404_vm14 = vcmp.ge.s32.totalorder %v385_v41, 1  ;;  %vm6433_vm4 = vmmov %vm6426_vm10 }
  0x69   : > { %v698_v29 = vrot.slane %v6425_v44, 7  ;;  %6427 = vst [vmem:[#allocation33_spill] sm:$0xff] %v5397_v0  ;;  %v6429_v57 = vsel %vm5399_vm3, 4294967295, %v6428_v57  ;;  %v2466_v34 = vsel %vm5370_vm11, %v5356_v56, 0  ;;  %v3576_v46 = vcombine.low %v915_v12, %v4622_v37  ;;  %vm5419_vm0 = vmand %vm1485_vm6, %vm6433_vm4 }
  0x6a   : > { %6430 = vst [vmem:[#allocation34_spill] sm:$0xff] %v6429_v57  ;;  %v2450_v62 = vor.u32 %v6210_v8, %v1467_v24  ;;  %v1982_v30 = vsel %vm1980_vm12, 65537, %v6340_v51  ;;  %v998_v15 = vsel %vm5374_vm9, %v5360_v3, 0  ;;  %v6434_v41 = vmov 0  ;;  %vm889_vm12 = vmpackc.low %vm5404_vm14, %vm5404_vm14 }
  0x6b   : > { %v6435_v41 = vsel %vm5419_vm0, 4294967295, %v6434_v41  ;;  %v3631_v55 = vcombine.low %v4622_v37, %v1647_v9  ;;  %vm5424_vm13 = vcmp.ge.s32.totalorder %v399_v61, 1  ;;  %v247_v12 = vadd.s32 192, %v4550_v7 }
  0x6c   : > { %v2467_v24 = vsel %vm5399_vm3, %v5397_v0, 0  ;;  %v6438_v8 = vshll.u32 %v4733_v31, 16  ;;  %v3577_v56 = vcombine.low %v917_v1, %v4622_v37  ;;  %v413_v9 = vand.u32 15, %v245_v54  ;;  %vm891_vm14 = vmpackc.low %vm5424_vm13, %vm5424_vm13 }
  0x6d   : > { %vm6439_vm6 = vcmask 31744   ;;  %v3649_v61 = vcombine.low %v1982_v30, %v4622_v37  ;;  %vm6442_vm3 = vsmask.f32 256  ;;  %vm5446_vm11 = vcmp.ne.s16.totalorder %v3576_v46, 0 }
  0x6e   : > { %v701_v2 = vor.u32 %v6438_v8, %v698_v29  ;;  %3953 = vmatmul.mubr.msk.bf16.gmra.mrb[8].mxu1 %vm6439_vm6, %v997_v11  ;;  %vm6440_vm10 = vmmov %vm6439_vm6  ;;  %v5444_v0 = vsel %vm6442_vm3, %v5267_v20, %v693_v43  ;;  %v6443_v8 = vmov 0  ;;  %v5452_v1 = vsel %vm5419_vm0, %v2450_v62, 0 }
  0x6f   : > { %4105 = vmatmul.mubr.msk.bf16.gmra.mrb[24].mxu0 %vm6440_vm10, %v2466_v34  ;;  %vm6441_vm4 = vmmov %vm6439_vm6  ;;  %v6444_v8 = vsel %vm5446_vm11, 4294967295, %v6443_v8  ;;  %6445 = vst [vmem:[#allocation35_spill] sm:$0xff] %v5452_v1  ;;  %v6446_v11 = vshrl.u32 %v4735_v32, 16  ;;  %vm5460_vm10 = vcmp.ne.s16.totalorder %v3631_v55, 0  ;;  %v6448_v20 = vmov 0 }
  0x70   : > { %3956 = vmatprep.mubr.msk.bf16.mxu1 %vm6441_vm4, %v998_v15  ;;  %vm6447_vm6 = vmmov %vm6441_vm4  ;;  %v6449_v20 = vsel %vm5460_vm10, 4294967295, %v6448_v20  ;;  %v919_v43 = vsel %vm889_vm12, 65537, %v6340_v51  ;;  %v427_v25 = vand.u32 15, %v247_v12  ;;  %v249_v34 = vadd.s32 208, %v4550_v7 }
  0x71   : > { %v706_v54 = vrot.slane %v6446_v11, 7  ;;  %4108 = vmatprep.mubr.msk.bf16.mxu0 %vm6447_vm6, %v2467_v24  ;;  %6450 = vst [vmem:[#allocation36_spill] sm:$0xff] %v6449_v20  ;;  %v5468_v46 = vsel %vm6442_vm3, %v5313_v16, %v701_v2  ;;  %vm5470_vm4 = vcmp.ne.s16.totalorder %v3577_v56, 0  ;;  %v6451_v62 = vmov 0 }
  0x72   : > { %v6452_v62 = vsel %vm5470_vm4, 4294967295, %v6451_v62  ;;  %v6453_v30 = vshrl.u32 %v4742_v35, 16  ;;  %vm5476_vm13 = vcmp.ge.s32.totalorder %v413_v9, 1  ;;  %vm5480_vm6 = vcmp.ne.s16.totalorder %v3649_v61, 0 }
  0x73   : > { %v6456_v44 = vmov 0  ;;  %v921_v12 = vsel %vm891_vm14, 65537, %v6340_v51  ;;  %v999_v2 = vsel %vm5446_vm11, %v5444_v0, 0  ;;  %v2468_v56 = vsel %vm5460_vm10, %v5452_v1, 0  ;;  %vm893_vm12 = vmpackc.low %vm5476_vm13, %vm5476_vm13 }
  0x74   : > { %v714_v15 = vrot.slane %v6453_v30, 7  ;;  %v6457_v44 = vsel %vm5480_vm6, 4294967295, %v6456_v44  ;;  %v6458_v16 = vshll.u32 %v4735_v32, 16  ;;  %v3578_v9 = vcombine.low %v919_v43, %v4622_v37 }
  0x75   : > { %v1000_v61 = vsel %vm5470_vm4, %v5468_v46, 0  ;;  %vm5500_vm14 = vcmp.ge.s32.totalorder %v427_v25, 1  ;;  %v441_v30 = vand.u32 15, %v249_v34  ;;  %v251_v1 = vadd.s32 224, %v4550_v7 }
  0x76   : > { %v709_v24 = vor.u32 %v6458_v16, %v706_v54  ;;  %v2717_v16 = vsel %vm5480_vm6, %v4896_v18, 0  ;;  %v6461_v43 = vshll.u32 %v4742_v35, 16  ;;  %v3579_v20 = vcombine.low %v921_v12, %v4622_v37  ;;  %vm895_vm6 = vmpackc.low %vm5500_vm14, %vm5500_vm14 }
  0x77   : > { %v6462_v55 = vshrl.u32 %v4804_v13, 16  ;;  %vm6463_vm3 = vcmask 31744   ;;  %v6464_v25 = vshrl.u32 %v4909_v10, 16  ;;  %v923_v34 = vsel %vm893_vm12, 65537, %v6340_v51 }
  0x78   : > { %v717_v32 = vor.u32 %v6461_v43, %v714_v15  ;;  %3957 = vmatmul.mubr.msk.bf16.gmra.mrb[12].mxu1 %vm6463_vm3, %v999_v2  ;;  %vm6465_vm13 = vmmov %vm6463_vm3  ;;  %vm6467_vm15 = vsmask.f32 256  ;;  %vm5527_vm0 = vcmp.ne.s16.totalorder %v3578_v9, 0  ;;  %v6468_v43 = vmov 0 }
  0x79   : > { %v722_v31 = vrot.slane %v6462_v55, 7  ;;  %v5516_v57 = vrot.slane %v6464_v25, 7  ;;  %4109 = vmatmul.mubr.msk.bf16.gmra.mrb[28].mxu0 %vm6465_vm13, %v2468_v56  ;;  %vm6466_vm10 = vmmov %vm6463_vm3  ;;  %v5525_v12 = vsel %vm6467_vm15, %v698_v29, %v709_v24  ;;  %v6469_v43 = vsel %vm5527_vm0, 4294967295, %v6468_v43 }
  0x7a   : > { %3960 = vmatprep.mubr.msk.bf16.mxu1 %vm6466_vm10, %v1000_v61  ;;  %4114 = vmatprep.mubr.msk.bf16.mxu0 %vm6463_vm3, %v2717_v16  ;;  %vm5532_vm4 = vcmp.ge.s32.totalorder %v441_v30, 1  ;;  %v455_v56 = vand.u32 15, %v251_v1  ;;  %vm6472_vm10 = vmmov %vm6467_vm15  ;;  %vm5539_vm12 = vcmp.ne.s16.totalorder %v3579_v20, 0  ;;  %v6473_v11 = vmov 0 }
  0x7b   : > { %v5537_v61 = vsel %vm6472_vm10, %v706_v54, %v717_v32  ;;  %v6474_v11 = vsel %vm5539_vm12, 4294967295, %v6473_v11  ;;  %v6475_v29 = vshll.u32 %v4804_v13, 16  ;;  %v253_v9 = vadd.s32 240, %v4550_v7  ;;  %vm897_vm15 = vmpackc.low %vm5532_vm4, %vm5532_vm4 }
  0x7c   : > { %v3580_v55 = vcombine.low %v923_v34, %v4622_v37  ;;  %v6476_v30 = vshll.u32 %v4909_v10, 16  ;;  %v925_v1 = vsel %vm895_vm6, 65537, %v6340_v51  ;;  %v2718_v32 = vsel %vm4890_vm7, %v5106_v45, 0  ;;  %vm6480_vm13 = vmmov %vm6472_vm10 }
  0x7d   : > { %v725_v24 = vor.u32 %v6475_v29, %v722_v31  ;;  %v1001_v54 = vsel %vm5527_vm0, %v5525_v12, 0  ;;  %vm6477_vm14 = vcmask 1041408   ;;  %v1002_v20 = vsel %vm5539_vm12, %v5537_v61, 0  ;;  %vm6482_vm4 = vmmov %vm6463_vm3 }
  0x7e   : > { %v733_v16 = vor.u32 %v6476_v30, %v5516_v57  ;;  %v2982_v7 = vsel %vm6477_vm14, %v4869_v14, 0  ;;  %v2719_v25 = vsel %vm5115_vm1, %v5189_v52, 0  ;;  %vm5568_vm6 = vcmp.ge.s32.totalorder %v455_v56, 1  ;;  %vm6486_vm14 = vmmov %vm6482_vm4 }
  0x7f   : > { %v5573_v29 = vsel %vm6480_vm13, %v714_v15, %v725_v24  ;;  %v3581_v2 = vcombine.low %v925_v1, %v4622_v37  ;;  %v6481_v30 = vshrl.u32 %v4990_v17, 16  ;;  %v469_v10 = vand.u32 15, %v253_v9  ;;  %v5592_v1 = vld [vmem:[%s6122_s1 + $0x10] sm:$0x3]  ;;  %vm6487_vm13 = vmmov %vm6482_vm4 }
  0x80   : > { %3961 = vmatmul.mubr.msk.bf16.gmra.mrb[16].mxu1 %vm6482_vm4, %v1001_v54  ;;  %vm5579_vm3 = vcmp.ne.s16.totalorder %v3580_v55, 0  ;;  %v6483_v13 = vmov 0  ;;  %v5584_v56 = vsel %vm6472_vm10, %v722_v31, %v733_v16  ;;  %v927_v18 = vsel %vm897_vm15, 65537, %v6340_v51  ;;  %vm899_vm4 = vmpackc.low %vm5568_vm6, %vm5568_vm6 }
  0x81   : > { %v738_v14 = vrot.slane %v6481_v30, 7  ;;  %v6484_v13 = vsel %vm5579_vm3, 4294967295, %v6483_v13  ;;  %v6485_v15 = vshrl.u32 %v4992_v38, 16  ;;  %4115 = vmatmul.mubr.msk.bf16.vlgmr.msra.gmra.mrb[0].mxu0 %vm6486_vm14, %v2718_v32  ;;  %3964 = vmatprep.mubr.msk.bf16.mxu1 %vm6487_vm13, %v1002_v20  ;;  %vm6488_vm15 = vmmov %vm6487_vm13  ;;  %vm6489_vm10 = vnez %v6452_v62  ;;  %v6665_v62 = vld [vmem:[#allocation24_spill] sm:$0xff] }
  0x82   : > { %4147 = vmatpush3.bf16.msra.mxu0 %v2982_v7  ;;  %4118 = vmatprep.mubr.msk.bf16.mxu0 %vm6488_vm15, %v2719_v25  ;;  %vm5624_vm14 = vcmp.ne.s16.totalorder %v3581_v2, 0  ;;  %vm5628_vm13 = vcmp.ge.s32.totalorder %v469_v10, 1  ;;  %vm6494_vm15 = vcmask 1041408   ;;  %v6495_v2 = vshll.u32 %v4990_v17, 16 }
  0x83   : > { %v746_v24 = vrot.slane %v6485_v15, 7  ;;  %4481 = vmatprep.subr.msk.bf16.mxu0 %vm6494_vm15, %v5592_v1  ;;  %v3582_v54 = vcombine.low %v927_v18, %v4622_v37  ;;  %v6496_v10 = vshll.u32 %v4992_v38, 16  ;;  %v929_v16 = vsel %vm899_vm4, 65537, %v6340_v51  ;;  %vm901_vm15 = vmpackc.low %vm5628_vm13, %vm5628_vm13 }
  0x84   : > { %v741_v30 = vor.u32 %v6495_v2, %v738_v14  ;;  %v1003_v15 = vsel %vm5579_vm3, %v5573_v29, 0  ;;  %v2720_v2 = vsel %vm5119_vm2, %v5228_v36, 0  ;;  %v1004_v18 = vsel %vm5624_vm14, %v5584_v56, 0 }
  0x85   : > { %v749_v32 = vor.u32 %v6496_v10, %v746_v24  ;;  %v6497_v34 = vshrl.u32 %v5249_v28, 16  ;;  %v2721_v20 = vsel %vm5217_vm5, %v5360_v3, 0  ;;  %v3583_v55 = vcombine.low %v929_v16, %v4622_v37 }
  0x86   : > { %vm6498_vm6 = vcmask 31744   ;;  %vm6499_vm4 = vsmask.f32 256  ;;  %vm5676_vm2 = vcmp.ne.s16.totalorder %v3582_v54, 0  ;;  %v6500_v25 = vmov 0  ;;  %v6559_v54 = vld [vmem:[#allocation26_spill] sm:$0xff] }
  0x87   : > { %v5665_v10 = vrot.slane %v6497_v34, 7  ;;  %v5674_v9 = vsel %vm6499_vm4, %v5516_v57, %v741_v30  ;;  %v6501_v25 = vsel %vm5676_vm2, 4294967295, %v6500_v25  ;;  %vm6502_vm13 = vmmov %vm6499_vm4  ;;  %v6503_v34 = vshrl.u32 %v5002_v21, 16 }
  0x88   : > { %3965 = vmatmul.mubr.msk.bf16.gmra.mrb[20].mxu1 %vm6498_vm6, %v1003_v15  ;;  %v5681_v31 = vsel %vm6502_vm13, %v738_v14, %v749_v32  ;;  %vm6504_vm1 = vmmov %vm6498_vm6  ;;  %v931_v16 = vsel %vm901_vm15, 65537, %v6340_v51  ;;  %vm5695_vm4 = vcmp.ne.s16.totalorder %v3583_v55, 0  ;;  %v6507_v14 = vmov 0 }
  0x89   : > { %v754_v38 = vrot.slane %v6503_v34, 7  ;;  %4119 = vmatmul.mubr.msk.bf16.gmra.mrb[4].mxu0 %vm6504_vm1, %v2720_v2  ;;  %vm6505_vm5 = vmmov %vm6504_vm1  ;;  %v6508_v14 = vsel %vm5695_vm4, 4294967295, %v6507_v14  ;;  %v6509_v32 = vshll.u32 %v5002_v21, 16  ;;  %v3584_v15 = vcombine.low %v931_v16, %v4622_v37 }
  0x8a   : > { %3968 = vmatprep.mubr.msk.bf16.mxu1 %vm6505_vm5, %v1004_v18  ;;  %vm6506_vm6 = vmmov %vm6504_vm1  ;;  %v6510_v2 = vshll.u32 %v5249_v28, 16  ;;  %v1005_v34 = vsel %vm5676_vm2, %v5674_v9, 0  ;;  %v2722_v55 = vsel %vm5271_vm8, %v5444_v0, 0  ;;  %v2723_v37 = vsel %vm5374_vm9, %v5468_v46, 0 }
  0x8b   : > { %4122 = vmatprep.mubr.msk.bf16.mxu0 %vm6506_vm6, %v2721_v20  ;;  %v757_v30 = vor.u32 %v6509_v32, %v754_v38  ;;  %v1006_v20 = vsel %vm5695_vm4, %v5681_v31, 0  ;;  %vm6511_vm5 = vmmov %vm6502_vm13  ;;  %vm5721_vm15 = vcmp.ne.s16.totalorder %v3584_v15, 0  ;;  %v6512_v32 = vmov 0 }
  0x8c   : > { %v1977_v18 = vor.u32 %v5665_v10, %v6510_v2  ;;  %v6513_v32 = vsel %vm5721_vm15, 4294967295, %v6512_v32  ;;  %vm6515_vm13 = vmmov %vm6511_vm5  ;;  %v2724_v15 = vsel %vm5446_vm11, %v5525_v12, 0  ;;  %vm6524_vm9 = vcmask 1041408  }
  0x8d   : > { %v5719_v16 = vsel %vm6511_vm5, %v746_v24, %v757_v30  ;;  %6514 = vst [vmem:[#allocation37_spill] sm:$0xff] %v6513_v32  ;;  %vm6517_vm6 = vmmov %vm6504_vm1  ;;  %vm6519_vm5 = vnez %v6435_v41  ;;  %v2726_v41 = vsel %vm5527_vm0, %v5573_v29, 0  ;;  %vm6525_vm11 = vnez %v6284_v60  ;;  %v6549_v24 = vld [vmem:[#allocation22_spill] sm:$0xff] }
  0x8e   : > { %v5726_v2 = vsel %vm6515_vm13, %v754_v38, %v1977_v18  ;;  %vm6518_vm8 = vmmov %vm6504_vm1  ;;  %v1487_v30 = vsel %vm6519_vm5, 0, %v4612_v33  ;;  %v1007_v38 = vsel %vm5721_vm15, %v5719_v16, 0  ;;  %v2055_v33 = vsel %vm6524_vm9, %v5255_v22, 0  ;;  %v4492_v22 = vld [vmem:[%s6122_s1 + $0x8] sm:$0x3] }
  0x8f   : > { %6516 = vst [vmem:[#allocation38_spill] sm:$0xff] %v5726_v2  ;;  %vm6521_vm13 = vmmov %vm6504_vm1  ;;  %vm6531_vm0 = vcmask 1041408  }
  0x90   : > { %3969 = vmatmul.mubr.msk.bf16.gmra.mrb[24].mxu1 %vm6504_vm1, %v1005_v34  ;;  %v2725_v34 = vsel %vm6489_vm10, %v5537_v61, 0  ;;  %vm6523_vm5 = vmmov %vm6504_vm1 }
  0x91   : > { %4123 = vmatmul.mubr.msk.bf16.gmra.mrb[8].mxu0 %vm6517_vm6, %v2722_v55  ;;  %3972 = vmatprep.mubr.msk.bf16.mxu1 %vm6518_vm8, %v1006_v20  ;;  %vm6520_vm8 = vnez %v6280_v23  ;;  %vm6522_vm6 = vmmov %vm6504_vm1  ;;  %v1714_v55 = vsel %vm6525_vm11, %v4762_v49, 0  ;;  %v2727_v20 = vsel %vm5539_vm12, %v5584_v56, 0  ;;  %vm6532_vm12 = vnez %v6291_v27 }
  0x92   : > { %4126 = vmatprep.mubr.msk.bf16.mxu0 %vm6504_vm1, %v2723_v37  ;;  %v1712_v18 = vsel %vm6520_vm8, %v1487_v30, 0  ;;  %vm6529_vm9 = vmmov %vm6504_vm1  ;;  %v1715_v30 = vsel %vm6532_vm12, %v4765_v50, 0  ;;  %vm6537_vm12 = vnez %v6301_v6 }
  0x98   : > { %3973 = vmatmul.mubr.msk.bf16.gmra.mrb[28].mxu1 %vm6521_vm13, %v1007_v38  ;;  %vm6526_vm13 = vnez %v6268_v48 }
  0x99   : > { %4127 = vmatmul.mubr.msk.bf16.gmra.mrb[12].mxu0 %vm6522_vm6, %v2724_v15  ;;  %3978 = vmatprep.mubr.msk.bf16.mxu1 %vm6504_vm1, %v1712_v18  ;;  %v6527_v37 = vsel %vm6526_vm13, %v4649_v47, 0  ;;  %vm6528_vm6 = vmmov %vm6504_vm1  ;;  %v2728_v47 = vsel %vm5579_vm3, %v5674_v9, 0  ;;  %v2729_v15 = vsel %vm5624_vm14, %v5681_v31, 0  ;;  %v1717_v18 = vsel %vm6537_vm12, %v4832_v39, 0 }
  0x9a   : > { %4130 = vmatprep.mubr.msk.bf16.mxu0 %vm6523_vm5, %v2725_v34  ;;  %vm6530_vm5 = vmmov %vm6504_vm1  ;;  %v2730_v34 = vsel %vm5676_vm2, %v5719_v16, 0  ;;  %v3178_v23 = vsel %vm6526_vm13, %v4765_v50, 0  ;;  %vm6638_vm13 = vnez %v6291_v27 }
  0x9b   : > { %v3180_v48 = vsel %vm6638_vm13, %v4832_v39, 0 }
  0xa0   : > { %3979 = vmatmul.mubr.msk.bf16.vlgmr.msra.gmra.mrb[0].mxu1 %vm6528_vm6, %v6527_v37  ;;  %vm6533_vm6 = vnez %v6293_v53 }
  0xa1   : > { %4011 = vmatpush3.bf16.msra.mxu1 %v2055_v33  ;;  %4131 = vmatmul.mubr.msk.bf16.gmra.mrb[16].mxu0 %vm6529_vm9, %v2726_v41  ;;  %v1716_v38 = vsel %vm6533_vm6, %v4819_v26, 0  ;;  %vm6534_vm9 = vmmov %vm6504_vm1  ;;  %v6538_v33 = vld [vmem:[#allocation15_spill] sm:$0xff]  ;;  %v3181_v50 = vsel %vm6533_vm6, %v4922_v19, 0  ;;  %vm6647_vm6 = vnez %v6501_v25 }
  0xa2   : > { %3982 = vmatprep.mubr.msk.bf16.mxu1 %vm6504_vm1, %v1714_v55  ;;  %4134 = vmatprep.mubr.msk.bf16.mxu0 %vm6530_vm5, %v2727_v20  ;;  %vm6539_vm3 = vnez %v6538_v33  ;;  %v2731_v55 = vsel %vm5695_vm4, %v5726_v2, 0  ;;  %v6543_v20 = vld [vmem:[#allocation18_spill] sm:$0xff]  ;;  %v6648_v39 = vsel %vm6647_vm6, %v5681_v31, 0  ;;  %v6683_v25 = vld [vmem:[#allocation35_spill] sm:$0xff] }
  0xa3   : > { %4477 = vmatprep.subr.msk.bf16.mxu1 %vm6531_vm0, %v4492_v22  ;;  %vm6535_vm0 = vmmov %vm6504_vm1  ;;  %v1718_v41 = vsel %vm6539_vm3, %v4922_v19, 0  ;;  %vm6544_vm12 = vnez %v6543_v20  ;;  %v6545_v22 = vld [vmem:[#allocation14_spill] sm:$0xff]  ;;  %v6558_v20 = vld [vmem:[#allocation23_spill] sm:$0xff] }
  0xa4   : > { %vm6536_vm5 = vmmov %vm6535_vm0  ;;  %v2716_v37 = vsel %vm6544_vm12, %v5665_v10, 0  ;;  %v6555_v10 = vld [vmem:[#allocation21_spill] sm:$0xff]  ;;  %v6571_v2 = vld [vmem:[#allocation30_spill] sm:$0xff] }
  0xa5   : > { %vm6554_vm4 = vmmov %vm6535_vm0  ;;  %v6675_v31 = vld [vmem:[#allocation30_spill] sm:$0xff] }
  0xa8   : > { %3983 = vmatmul.mubr.msk.bf16.gmra.mrb[4].mxu1 %vm6534_vm9, %v1715_v30  ;;  %vm6540_vm9 = vmmov %vm6535_vm0  ;;  %v6546_v30 = vld [vmem:[#allocation17_spill] sm:$0xff] }
  0xa9   : > { %4135 = vmatmul.mubr.msk.bf16.gmra.mrb[20].mxu0 %vm6504_vm1, %v2728_v47  ;;  %3986 = vmatprep.mubr.msk.bf16.mxu1 %vm6535_vm0, %v1716_v38  ;;  %vm6541_vm1 = vmmov %vm6535_vm0  ;;  %vm6547_vm2 = vnez %v6546_v30  ;;  %v2732_v38 = vsel %vm5721_vm15, %v2716_v37, 0  ;;  %vm6560_vm15 = vnez %v6559_v54  ;;  %v6570_v54 = vld [vmem:[#allocation27_spill] sm:$0xff] }
  0xaa   : > { %4138 = vmatprep.mubr.msk.bf16.mxu0 %vm6536_vm5, %v2729_v15  ;;  %vm6542_vm5 = vmmov %vm6535_vm0  ;;  %v1719_v47 = vsel %vm6547_vm2, %v6545_v22, 0  ;;  %v6548_v15 = vld [vmem:[#allocation16_spill] sm:$0xff]  ;;  %v1722_v37 = vsel %vm6560_vm15, %v6558_v20, 0  ;;  %vm6561_vm2 = vcmask 1041408   ;;  %vm6572_vm15 = vnez %v6571_v2 }
  0xab   : > { %v3240_v57 = vsel %vm6561_vm2, %v5592_v1, 0  ;;  %v1724_v32 = vsel %vm6572_vm15, %v6570_v54, 0  ;;  %vm6573_vm2 = vmmov %vm6535_vm0  ;;  %v6574_v1 = vld [vmem:[#allocation6_spill] sm:$0xff]  ;;  %v6584_v2 = vld [vmem:[#allocation8_spill] sm:$0xff] }
  0xac   : > { %vm6586_vm15 = vmmov %vm6535_vm0 }
  0xb0   : > { %3987 = vmatmul.mubr.msk.bf16.gmra.mrb[8].mxu1 %vm6540_vm9, %v1717_v18  ;;  %vm6550_vm9 = vnez %v6549_v24 }
  0xb1   : > { %4139 = vmatmul.mubr.msk.bf16.gmra.mrb[24].mxu0 %vm6541_vm1, %v2730_v34  ;;  %3990 = vmatprep.mubr.msk.bf16.mxu1 %vm6535_vm0, %v1718_v41  ;;  %v1720_v18 = vsel %vm6550_vm9, %v6548_v15, 0  ;;  %vm6551_vm1 = vmmov %vm6535_vm0  ;;  %v6553_v34 = vld [vmem:[#allocation3_spill] sm:$0xff]  ;;  %v6556_v41 = vld [vmem:[#allocation24_spill] sm:$0xff] }
  0xb2   : > { %4142 = vmatprep.mubr.msk.bf16.mxu0 %vm6542_vm5, %v2731_v55  ;;  %vm6552_vm5 = vmmov %vm6535_vm0  ;;  %vm6557_vm12 = vnez %v6556_v41 }
  0xb3   : > { %v1721_v55 = vsel %vm6557_vm12, %v6555_v10, 0  ;;  %vm6562_vm9 = vmmov %vm6535_vm0 }
  0xb4   : > { %vm6583_vm12 = vmmov %vm6535_vm0 }
  0xb8   : > { %3991 = vmatmul.mubr.msk.bf16.gmra.mrb[12].mxu1 %vm6551_vm1, %v1719_v47  ;;  %v6563_v47 = vld [vmem:[#allocation4_spill] sm:$0xff]  ;;  %vm6564_vm1 = vmmov %vm6535_vm0 }
  0xb9   : > { %4143 = vmatmul.mubr.msk.bf16.gmra.mrb[28].mxu0 %vm6535_vm0, %v2732_v38  ;;  %3994 = vmatprep.mubr.msk.bf16.mxu1 %vm6552_vm5, %v1720_v18  ;;  %v6565_v38 = vld [vmem:[#allocation5_spill] sm:$0xff] }
  0xba   : > { %4148 = vmatprep.mubr.msk.bf16.mxu0 %vm6554_vm4, %v6553_v34  ;;  %vm6566_vm4 = vmmov %vm6535_vm0  ;;  %v6567_v18 = vld [vmem:[#allocation25_spill] sm:$0xff]  ;;  %v6568_v34 = vld [vmem:[#allocation28_spill] sm:$0xff] }
  0xbb   : > { %vm6569_vm5 = vnez %v6568_v34 }
  0xbc   : > { %v1723_v41 = vsel %vm6569_vm5, %v6567_v18, 0 }
  0xc0   : > { %3995 = vmatmul.mubr.msk.bf16.gmra.mrb[16].mxu1 %vm6562_vm9, %v1721_v55  ;;  %vm6575_vm9 = vmmov %vm6535_vm0  ;;  %v6577_v55 = vld [vmem:[#allocation7_spill] sm:$0xff] }
  0xc1   : > { %4149 = vmatmul.mubr.msk.bf16.vlgmr.msra.gmra.mrb[0].mxu0 %vm6564_vm1, %v6563_v47  ;;  %3998 = vmatprep.mubr.msk.bf16.mxu1 %vm6535_vm0, %v1722_v37  ;;  %vm6576_vm1 = vmmov %vm6535_vm0  ;;  %v6580_v47 = vld [vmem:[#allocation31_spill] sm:$0xff] }
  0xc2   : > { %4181 = vmatpush3.bf16.msra.mxu0 %v3240_v57  ;;  %4152 = vmatprep.mubr.msk.bf16.mxu0 %vm6566_vm4, %v6565_v38  ;;  %v6578_v57 = vld [vmem:[#allocation29_spill] sm:$0xff]  ;;  %vm6579_vm4 = vnez %v6419_v63  ;;  %v6581_v38 = vld [vmem:[#allocation34_spill] sm:$0xff]  ;;  %v6592_v63 = vld [vmem:[#allocation20_spill] sm:$0xff] }
  0xc3   : > { %v1725_v37 = vsel %vm6579_vm4, %v6578_v57, 0  ;;  %vm6582_vm5 = vnez %v6581_v38  ;;  %v6595_v38 = vld [vmem:[#allocation10_spill] sm:$0xff] }
  0xc4   : > { %v1726_v34 = vsel %vm6582_vm5, %v6580_v47, 0 }
  0xc8   : > { %3999 = vmatmul.mubr.msk.bf16.gmra.mrb[20].mxu1 %vm6573_vm2, %v1723_v41  ;;  %vm6585_vm2 = vmmov %vm6535_vm0  ;;  %v6587_v41 = vld [vmem:[#allocation9_spill] sm:$0xff] }
  0xc9   : > { %4153 = vmatmul.mubr.msk.bf16.gmra.mrb[4].mxu0 %vm6575_vm9, %v6574_v1  ;;  %4002 = vmatprep.mubr.msk.bf16.mxu1 %vm6576_vm1, %v1724_v32  ;;  %vm6588_vm9 = vmmov %vm6535_vm0  ;;  %v6589_v32 = vld [vmem:[#allocation33_spill] sm:$0xff]  ;;  %v6590_v1 = vld [vmem:[#allocation36_spill] sm:$0xff] }
  0xca   : > { %4156 = vmatprep.mubr.msk.bf16.mxu0 %vm6535_vm0, %v6577_v55  ;;  %vm6591_vm1 = vnez %v6590_v1  ;;  %vm6593_vm0 = vnez %v6457_v44  ;;  %vm6594_vm4 = vmmov %vm6585_vm2  ;;  %v6602_v44 = vld [vmem:[#allocation11_spill] sm:$0xff] }
  0xcb   : > { %v1727_v55 = vsel %vm6591_vm1, %v6589_v32, 0  ;;  %v1988_v57 = vsel %vm6593_vm0, %v6592_v63, 0  ;;  %vm6597_vm5 = vmmov %vm6585_vm2  ;;  %vm6609_vm0 = vnez %v6346_v42 }
  0xcc   : > { %vm6606_vm1 = vmmov %vm6585_vm2  ;;  %v6610_v5 = vsel %vm6609_vm0, %v5189_v52, 0  ;;  %vm6621_vm0 = vnez %v6422_v59  ;;  %v3177_v52 = vsel %vm6520_vm8, %v4762_v49, 0  ;;  %v3179_v49 = vsel %vm6525_vm11, %v4819_v26, 0 }
  0xcd   : > { %vm6631_vm8 = vnez %v6469_v43  ;;  %vm6639_vm11 = vnez %v6484_v13  ;;  %v6643_v26 = vsel %vm5624_vm14, %v5674_v9, 0  ;;  %v3183_v13 = vsel %vm6539_vm3, %v6548_v15, 0  ;;  %v6667_v43 = vld [vmem:[#allocation26_spill] sm:$0xff] }
  0xce   : > { %v6640_v60 = vsel %vm6639_vm11, %v5584_v56, 0  ;;  %vm6651_vm14 = vnez %v6508_v14  ;;  %vm6656_vm3 = vnez %v6549_v24 }
  0xcf   : > { %v6652_v53 = vsel %vm6651_vm14, %v5719_v16, 0 }
  0xd0   : > { %4003 = vmatmul.mubr.msk.bf16.gmra.mrb[24].mxu1 %vm6583_vm12, %v1725_v37  ;;  %vm6596_vm12 = vmmov %vm6585_vm2  ;;  %v6601_v37 = vld [vmem:[#allocation2_spill] sm:$0xff] }
  0xd1   : > { %4157 = vmatmul.mubr.msk.bf16.gmra.mrb[8].mxu0 %vm6585_vm2, %v6584_v2  ;;  %4006 = vmatprep.mubr.msk.bf16.mxu1 %vm6586_vm15, %v1726_v34  ;;  %vm6598_vm15 = vmmov %vm6585_vm2  ;;  %v6599_v2 = vld [vmem:[#allocation12_spill] sm:$0xff] }
  0xd2   : > { %4160 = vmatprep.mubr.msk.bf16.mxu0 %vm6588_vm9, %v6587_v41  ;;  %v6600_v34 = vsel %vm4890_vm7, %v6599_v2, 0  ;;  %vm6603_vm9 = vmmov %vm6585_vm2 }
  0xd3   : > { %vm6611_vm7 = vmmov %vm6606_vm1 }
  0xd8   : > { %4007 = vmatmul.mubr.msk.bf16.gmra.mrb[28].mxu1 %vm6594_vm4, %v1727_v55  ;;  %vm6604_vm4 = vnez %v6344_v4 }
  0xd9   : > { %4161 = vmatmul.mubr.msk.bf16.gmra.mrb[12].mxu0 %vm6596_vm12, %v6595_v38  ;;  %4012 = vmatprep.mubr.msk.bf16.mxu1 %vm6597_vm5, %v1988_v57  ;;  %v6605_v63 = vsel %vm6604_vm4, %v5106_v45, 0  ;;  %v6607_v57 = vld [vmem:[#allocation13_spill] sm:$0xff]  ;;  %vm6608_vm5 = vmmov %vm6606_vm1  ;;  %v6616_v45 = vld [vmem:[#allocation19_spill] sm:$0xff]  ;;  %vm6618_vm4 = vnez %v6389_v58  ;;  %v6628_v58 = vsel %vm6489_vm10, %v5525_v12, 0  ;;  %vm6634_vm10 = vnez %v6474_v11 }
  0xda   : > { %4164 = vmatprep.mubr.msk.bf16.mxu0 %vm6598_vm15, %v4742_v35  ;;  %vm6612_vm12 = vmmov %vm6606_vm1  ;;  %vm6613_vm15 = vnez %v6377_v40  ;;  %v6619_v42 = vsel %vm6618_vm4, %v5360_v3, 0  ;;  %v6622_v40 = vsel %vm6621_vm0, %v5444_v0, 0  ;;  %v6632_v3 = vsel %vm6631_vm8, %v5537_v61, 0  ;;  %v6657_v0 = vld [vmem:[#allocation37_spill] sm:$0xff] }
  0xdb   : > { %v6614_v4 = vsel %vm6613_vm15, %v5228_v36, 0  ;;  %vm6625_vm15 = vnez %v6444_v8  ;;  %vm6630_vm4 = vmmov %vm6606_vm1  ;;  %v6635_v59 = vsel %vm6634_vm10, %v5573_v29, 0  ;;  %v6659_v8 = vld [vmem:[#allocation38_spill] sm:$0xff]  ;;  %v6672_v11 = vld [vmem:[#allocation29_spill] sm:$0xff] }
  0xdc   : > { %v6626_v36 = vsel %vm6625_vm15, %v5468_v46, 0  ;;  %vm6636_vm0 = vmmov %vm6606_vm1  ;;  %v6673_v29 = vld [vmem:[#allocation28_spill] sm:$0xff] }
  0xdd   : > { %vm6642_vm15 = vmmov %vm6636_vm0  ;;  %vm6674_vm14 = vnez %v6673_v29 }
  0xde   : > { %vm6649_vm8 = vmmov %vm6636_vm0  ;;  %v3188_v56 = vsel %vm6674_vm14, %v6672_v11, 0 }
  0xdf   : > { %vm6654_vm10 = vmmov %vm6636_vm0 }
  0xe0   : > { %4013 = vmatmul.mubr.msk.bf16.vlgmr.msra.gmra.mrb[0].mxu1 %vm6585_vm2, %v6600_v34  ;;  %vm6615_vm2 = vmmov %vm6606_vm1 }
  0xe1   : > { %4215 = vmatpush3.bf16.msra.mxu1 %v6601_v37  ;;  %4165 = vmatmul.mubr.msk.bf16.gmra.mrb[16].mxu0 %vm6603_vm9, %v6602_v44  ;;  %vm6617_vm9 = vmmov %vm6606_vm1 }
  0xe2   : > { %4016 = vmatprep.mubr.msk.bf16.mxu1 %vm6606_vm1, %v6605_v63  ;;  %4168 = vmatprep.mubr.msk.bf16.mxu0 %vm6608_vm5, %v6607_v57  ;;  %vm6620_vm5 = vmmov %vm6606_vm1 }
  0xe8   : > { %4017 = vmatmul.mubr.msk.bf16.gmra.mrb[4].mxu1 %vm6611_vm7, %v6610_v5  ;;  %vm6623_vm7 = vmmov %vm6606_vm1 }
  0xe9   : > { %4169 = vmatmul.mubr.msk.bf16.gmra.mrb[20].mxu0 %vm6612_vm12, %v4990_v17  ;;  %4020 = vmatprep.mubr.msk.bf16.mxu1 %vm6615_vm2, %v6614_v4  ;;  %vm6624_vm12 = vmmov %vm6606_vm1 }
  0xea   : > { %4172 = vmatprep.mubr.msk.bf16.mxu0 %vm6617_vm9, %v6616_v45  ;;  %vm6627_vm2 = vmmov %vm6606_vm1 }
  0xeb   : > { %vm6629_vm9 = vmmov %vm6606_vm1 }
  0xf0   : > { %4021 = vmatmul.mubr.msk.bf16.gmra.mrb[8].mxu1 %vm6606_vm1, %v6619_v42 }
  0xf1   : > { %4173 = vmatmul.mubr.msk.bf16.gmra.mrb[24].mxu0 %vm6620_vm5, %v5002_v21  ;;  %4024 = vmatprep.mubr.msk.bf16.mxu1 %vm6623_vm7, %v6622_v40  ;;  %vm6633_vm5 = vmmov %vm6606_vm1 }
  0xf2   : > { %4176 = vmatprep.mubr.msk.bf16.mxu0 %vm6624_vm12, %v5249_v28  ;;  %vm6637_vm7 = vmmov %vm6636_vm0 }
  0xf3   : > { %vm6641_vm12 = vmmov %vm6636_vm0 }
  0xf8   : > { %4025 = vmatmul.mubr.msk.bf16.gmra.mrb[12].mxu1 %vm6627_vm2, %v6626_v36  ;;  %vm6644_vm2 = vmmov %vm6636_vm0 }
  0xf9   : > { %4177 = vmatmul.mubr.bf16.gmra.mrb[28].mxu0 %v6340_v51  ;;  %4028 = vmatprep.mubr.msk.bf16.mxu1 %vm6629_vm9, %v6628_v58  ;;  %vm6645_vm9 = vmmov %vm6636_vm0 }
  0xfa   : > { %4182 = vmatprep.mubr.msk.bf16.mxu0 %vm6630_vm4, %v3177_v52  ;;  %vm6646_vm4 = vnez %v6301_v6  ;;  %v3185_v6 = vsel %vm6656_vm3, %v6558_v20, 0 }
  0xfb   : > { %v3182_v27 = vsel %vm6646_vm4, %v6545_v22, 0 }
 0x100   : > { %4029 = vmatmul.mubr.msk.bf16.gmra.mrb[16].mxu1 %vm6606_vm1, %v6632_v3  ;;  %vm6650_vm1 = vmmov %vm6636_vm0 }
 0x101   : > { %4183 = vmatmul.mubr.msk.bf16.vlgmr.msra.gmra.mrb[0].mxu0 %vm6633_vm5, %v3178_v23  ;;  %4032 = vmatprep.mubr.msk.bf16.mxu1 %vm6636_vm0, %v6635_v59  ;;  %vm6653_vm5 = vmmov %vm6636_vm0  ;;  %vm6655_vm0 = vnez %v6546_v30 }
 0x102   : > { %4186 = vmatprep.mubr.msk.bf16.mxu0 %vm6637_vm7, %v3179_v49  ;;  %v3184_v19 = vsel %vm6655_vm0, %v6555_v10, 0  ;;  %vm6658_vm7 = vnez %v6657_v0  ;;  %vm6661_vm13 = vmmov %vm6650_vm1 }
 0x103   : > { %v6660_v46 = vsel %vm6658_vm7, %v6659_v8, 0  ;;  %vm6662_vm11 = vmmov %vm6650_vm1 }
 0x104   : > { %vm6669_vm4 = vmmov %vm6650_vm1 }
 0x105   : > { %vm6670_vm6 = vmmov %vm6650_vm1 }
 0x106   : > { %vm6678_vm0 = vmmov %vm6650_vm1 }
 0x107   : > { %vm6679_vm3 = vmmov %vm6678_vm0 }
 0x108   : > { %4033 = vmatmul.mubr.msk.bf16.gmra.mrb[20].mxu1 %vm6641_vm12, %v6640_v60  ;;  %vm6663_vm12 = vmmov %vm6650_vm1 }
 0x109   : > { %4187 = vmatmul.mubr.msk.bf16.gmra.mrb[4].mxu0 %vm6642_vm15, %v3180_v48  ;;  %4036 = vmatprep.mubr.msk.bf16.mxu1 %vm6644_vm2, %v6643_v26  ;;  %vm6664_vm15 = vmmov %vm6650_vm1  ;;  %vm6666_vm2 = vnez %v6665_v62 }
 0x10a   : > { %4190 = vmatprep.mubr.msk.bf16.mxu0 %vm6645_vm9, %v3181_v50  ;;  %v3186_v12 = vsel %vm6666_vm2, %v6567_v18, 0  ;;  %vm6668_vm9 = vnez %v6667_v43  ;;  %vm6680_vm7 = vmmov %vm6678_vm0 }
 0x10b   : > { %v3187_v61 = vsel %vm6668_vm9, %v6570_v54, 0  ;;  %v6684_v54 = vld [vmem:[#allocation34_spill] sm:$0xff]  ;;  %vm6688_vm2 = vmmov %vm6678_vm0 }
 0x10c   : > { %vm6689_vm9 = vmmov %vm6678_vm0 }
 0x110   : > { %4037 = vmatmul.mubr.msk.bf16.gmra.mrb[24].mxu1 %vm6649_vm8, %v6648_v39  ;;  %vm6671_vm8 = vmmov %vm6650_vm1 }
 0x111   : > { %4191 = vmatmul.mubr.msk.bf16.gmra.mrb[8].mxu0 %vm6650_vm1, %v3182_v27  ;;  %4040 = vmatprep.mubr.msk.bf16.mxu1 %vm6653_vm5, %v6652_v53  ;;  %vm6676_vm5 = vnez %v6675_v31 }
 0x112   : > { %4194 = vmatprep.mubr.msk.bf16.mxu0 %vm6654_vm10, %v3183_v13  ;;  %v3189_v9 = vsel %vm6676_vm5, %v6580_v47, 0  ;;  %vm6677_vm10 = vmmov %vm6650_vm1 }
 0x118   : > { %4041 = vmatmul.mubr.msk.bf16.gmra.mrb[28].mxu1 %vm6661_vm13, %v6660_v46 }
 0x119   : > { %4195 = vmatmul.mubr.msk.bf16.gmra.mrb[12].mxu0 %vm6662_vm11, %v3184_v19  ;;  %4062 = vmatprep.mubr.msk.bf16.mxu1 %vm6663_vm12, %v6595_v38  ;;  %vm6685_vm11 = vnez %v6684_v54  ;;  %vm6686_vm12 = vmmov %vm6678_vm0 }
 0x11a   : > { %4198 = vmatprep.mubr.msk.bf16.mxu0 %vm6664_vm15, %v3185_v6  ;;  %v3191_v14 = vsel %vm6685_vm11, %v6683_v25, 0  ;;  %vm6687_vm15 = vmmov %vm6678_vm0 }
 0x120   : > { %4063 = vmatmul.mubr.msk.bf16.vlgmr.msra.gmra.mrb[16].mxu1 %vm6669_vm4, %v4742_v35  ;;  %v6681_v35 = vld [vmem:[#allocation32_spill] sm:$0xff]  ;;  %vm6690_vm4 = vmmov %vm6678_vm0 }
 0x121   : > { %4199 = vmatmul.mubr.msk.bf16.gmra.mrb[16].mxu0 %vm6670_vm6, %v3186_v12  ;;  %4066 = vmatprep.mubr.msk.bf16.mxu1 %vm6671_vm8, %v6602_v44  ;;  %vm6682_vm13 = vnez %v6681_v35 }
 0x122   : > { %4202 = vmatprep.mubr.msk.bf16.mxu0 %vm6650_vm1, %v3187_v61  ;;  %v3190_v7 = vsel %vm6682_vm13, %v6589_v32, 0 }
 0x128   : > { %4067 = vmatmul.mubr.msk.bf16.gmra.mrb[20].mxu1 %vm6677_vm10, %v6607_v57 }
 0x129   : > { %4203 = vmatmul.mubr.msk.bf16.gmra.mrb[20].mxu0 %vm6678_vm0, %v3188_v56  ;;  %4070 = vmatprep.mubr.msk.bf16.mxu1 %vm6679_vm3, %v4990_v17 }
 0x12a   : > { %4206 = vmatprep.mubr.msk.bf16.mxu0 %vm6680_vm7, %v3189_v9 }
 0x130   : > { %4071 = vmatmul.mubr.msk.bf16.gmra.mrb[24].mxu1 %vm6686_vm12, %v6616_v45 }
 0x131   : > { %4207 = vmatmul.mubr.msk.bf16.gmra.mrb[24].mxu0 %vm6687_vm15, %v3190_v7  ;;  %4074 = vmatprep.mubr.msk.bf16.mxu1 %vm6688_vm2, %v5002_v21 }
 0x132   : > { %4210 = vmatprep.mubr.msk.bf16.mxu0 %vm6689_vm9, %v3191_v14 }
 0x138   : > { %4075 = vmatmul.mubr.msk.bf16.gmra.mrb[28].mxu1 %vm6690_vm4, %v5249_v28 }
 0x139   : > { %4211 = vmatmul.mubr.bf16.gmra.mrb[28].mxu0 %v6340_v51  ;;  %v6045_v51 = vld [vmem:[%s6123_s2] ss:$0 sm:$0xff] }
 0x1b3   : > { %v4014_v17 = vpop.f32.mrb[0].mxu1 }
 0x1b4   : > { %v2091_v16 = vpop.f32.mrb[1].mxu1 }
 0x1b5   : > { %v4015_v24 = vpop.f32.mrb[2].mxu1 }
 0x1b6   : > { %v2094_v33 = vpop.f32.mrb[3].mxu1 }
 0x1bb   : > { %v4018_v22 = vpop.f32.mrb[4].mxu1 }
 0x1bc   : > { %v2107_v30 = vpop.f32.mrb[5].mxu1 }
 0x1bd   : > { %v4019_v15 = vpop.f32.mrb[6].mxu1 }
 0x1be   : > { %v2110_v10 = vpop.f32.mrb[7].mxu1 }
 0x1c3   : > { %v4022_v20 = vpop.f32.mrb[8].mxu1 }
 0x1c4   : > { %v2123_v18 = vpop.f32.mrb[9].mxu1 }
 0x1c5   : > { %v4023_v47 = vpop.f32.mrb[10].mxu1 }
 0x1c6   : > { %v2126_v21 = vpop.f32.mrb[11].mxu1 }
 0x1cb   : > { %v4026_v38 = vpop.f32.mrb[12].mxu1 }
 0x1cc   : > { %v2139_v41 = vpop.f32.mrb[13].mxu1 }
 0x1cd   : > { %v4027_v32 = vpop.f32.mrb[14].mxu1 }
 0x1ce   : > { %v2142_v1 = vpop.f32.mrb[15].mxu1 }
 0x1d4   : > { %v4184_v28 = vpop.f32.mrb[0].mxu0 }
 0x1d5   : > { %v4216_v55 = vadd.f32 %v4184_v28, %v4014_v17  ;;  %v3276_v2 = vpop.f32.mrb[1].mxu0 }
 0x1d6   : > { %v4217_v34 = vadd.f32 %v3276_v2, %v2091_v16  ;;  %v4185_v37 = vpop.f32.mrb[2].mxu0 }
 0x1d7   : > { %v3444_v44 = vadd.f32 %v4216_v55, %v6045_v51  ;;  %v4218_v63 = vadd.f32 %v4185_v37, %v4015_v24  ;;  %v3279_v57 = vpop.f32.mrb[3].mxu0 }
 0x1d8   : > { %v3442_v5 = vadd.f32 %v4217_v34, %v6045_v51  ;;  %v4219_v4 = vadd.f32 %v3279_v57, %v2094_v33 }
 0x1d9   : > { %3476 = vst [vmem:[%s6052_s17 + $0x10] sm:$0xff] %v3444_v44  ;;  %v3445_v45 = vadd.f32 %v4218_v63, %v6045_v51 }
 0x1da   : > { %3474 = vst [vmem:[%s6052_s17] sm:$0xff] %v3442_v5  ;;  %v3443_v42 = vadd.f32 %v4219_v4, %v6045_v51 }
 0x1db   : > { %3477 = vst [vmem:[%s6052_s17 + $0x18] sm:$0xff] %v3445_v45 }
 0x1dc   : > { %3475 = vst [vmem:[%s6052_s17 + $0x8] sm:$0xff] %v3443_v42  ;;  %v4188_v40 = vpop.f32.mrb[4].mxu0 }
 0x1dd   : > { %v4220_v52 = vadd.f32 %v4188_v40, %v4018_v22  ;;  %v3292_v36 = vpop.f32.mrb[5].mxu0 }
 0x1de   : > { %v4221_v58 = vadd.f32 %v3292_v36, %v2107_v30  ;;  %v4189_v23 = vpop.f32.mrb[6].mxu0 }
 0x1df   : > { %v3448_v49 = vadd.f32 %v4220_v52, %v6045_v51  ;;  %v4222_v3 = vadd.f32 %v4189_v23, %v4019_v15  ;;  %v3295_v59 = vpop.f32.mrb[7].mxu0 }
 0x1e0   : > { %v3446_v48 = vadd.f32 %v4221_v58, %v6045_v51  ;;  %v4223_v50 = vadd.f32 %v3295_v59, %v2110_v10 }
 0x1e1   : > { %3480 = vst [vmem:[%s6052_s17 + $0x30] sm:$0xff] %v3448_v49  ;;  %v3449_v60 = vadd.f32 %v4222_v3, %v6045_v51 }
 0x1e2   : > { %3478 = vst [vmem:[%s6052_s17 + $0x20] sm:$0xff] %v3446_v48  ;;  %v3447_v26 = vadd.f32 %v4223_v50, %v6045_v51 }
 0x1e3   : > { %3481 = vst [vmem:[%s6052_s17 + $0x38] sm:$0xff] %v3449_v60 }
 0x1e4   : > { %3479 = vst [vmem:[%s6052_s17 + $0x28] sm:$0xff] %v3447_v26  ;;  %v4192_v27 = vpop.f32.mrb[8].mxu0 }
 0x1e5   : > { %v4224_v13 = vadd.f32 %v4192_v27, %v4022_v20  ;;  %v3308_v39 = vpop.f32.mrb[9].mxu0 }
 0x1e6   : > { %v4225_v53 = vadd.f32 %v3308_v39, %v2123_v18  ;;  %v4193_v19 = vpop.f32.mrb[10].mxu0 }
 0x1e7   : > { %v3452_v6 = vadd.f32 %v4224_v13, %v6045_v51  ;;  %v4226_v0 = vadd.f32 %v4193_v19, %v4023_v47  ;;  %v3311_v8 = vpop.f32.mrb[11].mxu0 }
 0x1e8   : > { %v3450_v46 = vadd.f32 %v4225_v53, %v6045_v51  ;;  %v4227_v62 = vadd.f32 %v3311_v8, %v2126_v21 }
 0x1e9   : > { %3484 = vst [vmem:[%s6052_s17 + $0x50] sm:$0xff] %v3452_v6  ;;  %v3453_v12 = vadd.f32 %v4226_v0, %v6045_v51 }
 0x1ea   : > { %3482 = vst [vmem:[%s6052_s17 + $0x40] sm:$0xff] %v3450_v46  ;;  %v3451_v43 = vadd.f32 %v4227_v62, %v6045_v51 }
 0x1eb   : > { %3485 = vst [vmem:[%s6052_s17 + $0x58] sm:$0xff] %v3453_v12 }
 0x1ec   : > { %3483 = vst [vmem:[%s6052_s17 + $0x48] sm:$0xff] %v3451_v43  ;;  %v4196_v61 = vpop.f32.mrb[12].mxu0 }
 0x1ed   : > { %v4228_v11 = vadd.f32 %v4196_v61, %v4026_v38  ;;  %v3324_v29 = vpop.f32.mrb[13].mxu0 }
 0x1ee   : > { %v4229_v56 = vadd.f32 %v3324_v29, %v2139_v41  ;;  %v4197_v31 = vpop.f32.mrb[14].mxu0 }
 0x1ef   : > { %v3456_v9 = vadd.f32 %v4228_v11, %v6045_v51  ;;  %v4230_v35 = vadd.f32 %v4197_v31, %v4027_v32  ;;  %v3327_v7 = vpop.f32.mrb[15].mxu0 }
 0x1f0   : > { %v3454_v25 = vadd.f32 %v4229_v56, %v6045_v51  ;;  %v4231_v54 = vadd.f32 %v3327_v7, %v2142_v1 }
 0x1f1   : > { %3488 = vst [vmem:[%s6052_s17 + $0x70] sm:$0xff] %v3456_v9  ;;  %v3457_v14 = vadd.f32 %v4230_v35, %v6045_v51 }
 0x1f2   : > { %3486 = vst [vmem:[%s6052_s17 + $0x60] sm:$0xff] %v3454_v25  ;;  %v3455_v17 = vadd.f32 %v4231_v54, %v6045_v51 }
 0x1f3   : > { %3489 = vst [vmem:[%s6052_s17 + $0x78] sm:$0xff] %v3457_v14  ;;  %v4064_v16 = vpop.f32.mrb[16].mxu1 }
 0x1f4   : > { %3487 = vst [vmem:[%s6052_s17 + $0x68] sm:$0xff] %v3455_v17  ;;  %v2355_v24 = vpop.f32.mrb[17].mxu1  ;;  %v4200_v33 = vpop.f32.mrb[16].mxu0 }
 0x1f5   : > { %v4232_v22 = vadd.f32 %v4200_v33, %v4064_v16  ;;  %v4065_v30 = vpop.f32.mrb[18].mxu1  ;;  %v3340_v15 = vpop.f32.mrb[17].mxu0 }
 0x1f6   : > { %v4233_v10 = vadd.f32 %v3340_v15, %v2355_v24  ;;  %v2358_v20 = vpop.f32.mrb[19].mxu1  ;;  %v4201_v18 = vpop.f32.mrb[18].mxu0 }
 0x1f7   : > { %v3460_v47 = vadd.f32 %v4232_v22, %v6045_v51  ;;  %v4234_v21 = vadd.f32 %v4201_v18, %v4065_v30  ;;  %v3343_v38 = vpop.f32.mrb[19].mxu0 }
 0x1f8   : > { %v3458_v41 = vadd.f32 %v4233_v10, %v6045_v51  ;;  %v4235_v32 = vadd.f32 %v3343_v38, %v2358_v20 }
 0x1f9   : > { %3492 = vst [vmem:[%s6052_s17 + $0x90] sm:$0xff] %v3460_v47  ;;  %v3461_v1 = vadd.f32 %v4234_v21, %v6045_v51 }
 0x1fa   : > { %3490 = vst [vmem:[%s6052_s17 + $0x80] sm:$0xff] %v3458_v41  ;;  %v3459_v28 = vadd.f32 %v4235_v32, %v6045_v51 }
 0x1fb   : > { %3493 = vst [vmem:[%s6052_s17 + $0x98] sm:$0xff] %v3461_v1  ;;  %v4068_v55 = vpop.f32.mrb[20].mxu1 }
 0x1fc   : > { %3491 = vst [vmem:[%s6052_s17 + $0x88] sm:$0xff] %v3459_v28  ;;  %v2371_v2 = vpop.f32.mrb[21].mxu1  ;;  %v4204_v34 = vpop.f32.mrb[20].mxu0 }
 0x1fd   : > { %v4236_v37 = vadd.f32 %v4204_v34, %v4068_v55  ;;  %v4069_v44 = vpop.f32.mrb[22].mxu1  ;;  %v3356_v63 = vpop.f32.mrb[21].mxu0 }
 0x1fe   : > { %v4237_v57 = vadd.f32 %v3356_v63, %v2371_v2  ;;  %v2374_v5 = vpop.f32.mrb[23].mxu1  ;;  %v4205_v4 = vpop.f32.mrb[22].mxu0 }
 0x1ff   : > { %v3464_v45 = vadd.f32 %v4236_v37, %v6045_v51  ;;  %v4238_v42 = vadd.f32 %v4205_v4, %v4069_v44  ;;  %v3359_v40 = vpop.f32.mrb[23].mxu0 }
 0x200   : > { %v3462_v52 = vadd.f32 %v4237_v57, %v6045_v51  ;;  %v4239_v36 = vadd.f32 %v3359_v40, %v2374_v5 }
 0x201   : > { %3496 = vst [vmem:[%s6052_s17 + $0xb0] sm:$0xff] %v3464_v45  ;;  %v3465_v58 = vadd.f32 %v4238_v42, %v6045_v51 }
 0x202   : > { %3494 = vst [vmem:[%s6052_s17 + $0xa0] sm:$0xff] %v3462_v52  ;;  %v3463_v23 = vadd.f32 %v4239_v36, %v6045_v51 }
 0x203   : > { %3497 = vst [vmem:[%s6052_s17 + $0xb8] sm:$0xff] %v3465_v58  ;;  %v4072_v49 = vpop.f32.mrb[24].mxu1 }
 0x204   : > { %3495 = vst [vmem:[%s6052_s17 + $0xa8] sm:$0xff] %v3463_v23  ;;  %v2387_v3 = vpop.f32.mrb[25].mxu1  ;;  %v4208_v59 = vpop.f32.mrb[24].mxu0 }
 0x205   : > { %v4240_v48 = vadd.f32 %v4208_v59, %v4072_v49  ;;  %v4073_v50 = vpop.f32.mrb[26].mxu1  ;;  %v3372_v60 = vpop.f32.mrb[25].mxu0 }
 0x206   : > { %v4241_v26 = vadd.f32 %v3372_v60, %v2387_v3  ;;  %v2390_v27 = vpop.f32.mrb[27].mxu1  ;;  %v4209_v13 = vpop.f32.mrb[26].mxu0 }
 0x207   : > { %v3468_v39 = vadd.f32 %v4240_v48, %v6045_v51  ;;  %v4242_v53 = vadd.f32 %v4209_v13, %v4073_v50  ;;  %v3375_v19 = vpop.f32.mrb[27].mxu0 }
 0x208   : > { %v3466_v6 = vadd.f32 %v4241_v26, %v6045_v51  ;;  %v4243_v0 = vadd.f32 %v3375_v19, %v2390_v27 }
 0x209   : > { %3500 = vst [vmem:[%s6052_s17 + $0xd0] sm:$0xff] %v3468_v39  ;;  %v3469_v8 = vadd.f32 %v4242_v53, %v6045_v51 }
 0x20a   : > { %3498 = vst [vmem:[%s6052_s17 + $0xc0] sm:$0xff] %v3466_v6  ;;  %v3467_v46 = vadd.f32 %v4243_v0, %v6045_v51 }
 0x20b   : > { %3501 = vst [vmem:[%s6052_s17 + $0xd8] sm:$0xff] %v3469_v8  ;;  %v4076_v62 = vpop.f32.mrb[28].mxu1 }
 0x20c   : > { %3499 = vst [vmem:[%s6052_s17 + $0xc8] sm:$0xff] %v3467_v46  ;;  %v2403_v12 = vpop.f32.mrb[29].mxu1  ;;  %v4212_v43 = vpop.f32.mrb[28].mxu0 }
 0x20d   : > { %v4244_v61 = vadd.f32 %v4212_v43, %v4076_v62  ;;  %v4077_v11 = vpop.f32.mrb[30].mxu1  ;;  %v3388_v29 = vpop.f32.mrb[29].mxu0 }
 0x20e   : > { %v4245_v56 = vadd.f32 %v3388_v29, %v2403_v12  ;;  %v2406_v31 = vpop.f32.mrb[31].mxu1  ;;  %v4213_v9 = vpop.f32.mrb[30].mxu0 }
 0x20f   : > { %v3472_v35 = vadd.f32 %v4244_v61, %v6045_v51  ;;  %v4246_v7 = vadd.f32 %v4213_v9, %v4077_v11  ;;  %v3391_v25 = vpop.f32.mrb[31].mxu0 }
 0x210   : > { %v3470_v54 = vadd.f32 %v4245_v56, %v6045_v51  ;;  %v4247_v14 = vadd.f32 %v3391_v25, %v2406_v31 }
 0x211   : > { %3504 = vst [vmem:[%s6052_s17 + $0xf0] sm:$0xff] %v3472_v35  ;;  %v3473_v17 = vadd.f32 %v4246_v7, %v6045_v51 }
 0x212   : > { %3502 = vst [vmem:[%s6052_s17 + $0xe0] sm:$0xff] %v3470_v54  ;;  %v3471_v16 = vadd.f32 %v4247_v14, %v6045_v51 }
 0x213   : > { %3505 = vst [vmem:[%s6052_s17 + $0xf8] sm:$0xff] %v3473_v17 }
 0x214   : > { %3503 = vst [vmem:[%s6052_s17 + $0xe8] sm:$0xff] %v3471_v16 }
 0x215 PF: > { %s13_s12 = sadd.s32 1, %s4499_s12  }
 0x216   : > { %p10_p4 = scmp.ge.s32.totalorder %s13_s12, 4  }
 0x218   :  { %12 = sbr.rel (!%p10_p4) target bundleno = 1 (0x1), region = 70 }

</bundles_post_ra>
